<compile_context>
chip_gen: v7x
topology: tpu7x:2x2x1
jax: 0.10.0
libtpu: 0.0.40
codegen_flags: <defaults>
</compile_context>

<pallas_src>
import jax
import jax.numpy as jnp
import numpy as np
from jax.experimental import pallas as pl
from jax.experimental.pallas import tpu as pltpu

# ----------------------------- model constants ------------------------------
# Small-shape stand-ins consistent with the module (its globals are 28/256/28).
INPUT_SIZE = 16
HIDDEN_SIZE = 32
NUM_LAYERS = 2        # fused kernel hardcodes 2 layers (matches the module)
SEQ_LEN = 8
NUM_CLASSES = 10
BATCH = 8             # one full sublane group; scales to 64-128 for throughput
FC_PAD = 128          # classifier output padded to one full lane group


# ------------------------------ Pallas kernel --------------------------------
def fused_lstm_fc_kernel(x_ref, wih0_ref, b0_ref, wblk_ref, b1_ref,
                         wfc_ref, bfc_ref, out_ref, fcin_scr):
    """Entire forward pass (2-layer LSTM + FC) in one kernel invocation.

    x_ref    : (B, T*IN)   batch-first input, f32 (cast to bf16 once in-kernel)
    wih0_ref : (IN, 4H)    layer-0 input->gates weight, bf16, gate-pre-scaled
    b0_ref   : (1, 4H)     layer-0 combined bias (b_ih+b_hh), f32, pre-scaled
    wblk_ref : (2H, 8H)    fused recurrent block weight, bf16, pre-scaled:
                           [[W_hh0, W_ih1], [0, W_hh1]]
    b1_ref   : (1, 4H)     layer-1 combined bias, f32, pre-scaled
    wfc_ref  : (T*H, 128)  classifier weight (transposed, lane-padded), bf16
    bfc_ref  : (1, 128)    classifier bias (lane-padded), f32
    out_ref  : (B, 128)    logits, lane-dense single HBM store
    fcin_scr : (B, T*H)    VMEM classifier-input slab (== out.reshape(B,-1))
    """
    B = out_ref.shape[0]
    IN = wih0_ref.shape[0]
    H = wih0_ref.shape[1] // 4
    T = x_ref.shape[1] // IN
    f32 = jnp.float32
    bf16 = jnp.bfloat16

    # ---- loop-invariant values, hoisted out of the unrolled recurrence ----
    xb = x_ref[...].astype(bf16)                         # (B, T*IN), one cast
    wih0 = wih0_ref[...]                                 # (IN, 4H) bf16
    wblk = wblk_ref[...]                                 # (2H, 8H) bf16
    b0 = jnp.broadcast_to(b0_ref[...], (B, 4 * H))       # hoisted broadcasts
    b1 = jnp.broadcast_to(b1_ref[...], (B, 4 * H))

    # sigmoid(z) = 0.5*tanh(z/2) + 0.5.  The z/2 pre-scale on the i/f/o gate
    # columns is folded into the weights/biases at init time, so one tanh plus
    # this per-lane multiply-add recovers all four gate activations.
    lane = jax.lax.broadcasted_iota(jnp.int32, (B, 4 * H), 1)
    is_g = jnp.logical_and(lane >= 2 * H, lane < 3 * H)  # g-gate lanes (tanh)
    post_mul = jnp.where(is_g, 1.0, 0.5).astype(f32)
    post_add = jnp.where(is_g, 0.0, 0.5).astype(f32)

    def gates_x0(t):
        # Layer-0 input projection for timestep t: off the serial chain.
        x_t = xb[:, t * IN:(t + 1) * IN]                 # (B, IN) lane slice
        return jnp.dot(x_t, wih0, preferred_element_type=f32) + b0

    def cell(gates, c_prev):
        th = jnp.tanh(gates)                             # single EUP push
        act = th * post_mul + post_add                   # i,f,o->sigmoid, g->tanh
        i_g = act[:, 0 * H:1 * H]
        f_g = act[:, 1 * H:2 * H]
        g_g = act[:, 2 * H:3 * H]
        o_g = act[:, 3 * H:4 * H]
        c_new = f_g * c_prev + i_g * g_g
        h_new = o_g * jnp.tanh(c_new)
        return h_new, c_new

    # -------- wavefront over the two layers (static, fully unrolled) --------
    # Iteration s: layer 0 runs timestep s (s < T) and layer 1 runs timestep
    # s-1 (s >= 1).  Zero initial hidden/cell state matches the PyTorch module.
    zero = jnp.zeros((B, H), f32)
    h1, c1 = zero, zero

    # s = 0: layer 0 only; recurrent contribution is zero, so skip the matmul.
    h0, c0 = cell(gates_x0(0), zero)

    for s in range(1, T + 1):
        # One fused recurrent matmul for both layers this step.
        hh = jnp.concatenate([h0, h1], axis=1).astype(bf16)      # (B, 2H)
        big = jnp.dot(hh, wblk, preferred_element_type=f32)      # (B, 8H)

        if s < T:                                                 # layer 0, t=s
            new_h0, new_c0 = cell(gates_x0(s) + big[:, :4 * H], c0)

        h1, c1 = cell(big[:, 4 * H:] + b1, c1)                    # layer 1, t=s-1
        fcin_scr[:, (s - 1) * H:s * H] = h1                       # write as produced

        if s < T:
            h0, c0 = new_h0, new_c0

    # ---------------- FC classifier (lane-padded to 128 outputs) -------------
    out_ref[...] = (
        jnp.dot(fcin_scr[...].astype(bf16), wfc_ref[...],
                preferred_element_type=f32)
        + bfc_ref[...]
    ).astype(out_ref.dtype)


# ------------------------------ wrapper ---------------------------------------
@jax.jit
def lstm_model_forward(x, params):
    """x: (B, T, IN) batch-first, like the PyTorch module. Returns (B, C)."""
    B, T, IN = x.shape
    H = HIDDEN_SIZE
    # Free, layout-preserving reshape -- no XLA transpose before the kernel.
    x2d = x.astype(jnp.float32).reshape(B, T * IN)

    k = params["kernel"]
    out_pad = pl.pallas_call(
        fused_lstm_fc_kernel,
        out_shape=jax.ShapeDtypeStruct((B, FC_PAD), jnp.float32),
        in_specs=[
            pl.BlockSpec((B, T * IN), lambda: (0, 0)),
            pl.BlockSpec((IN, 4 * H), lambda: (0, 0)),
            pl.BlockSpec((1, 4 * H), lambda: (0, 0)),
            pl.BlockSpec((2 * H, 8 * H), lambda: (0, 0)),
            pl.BlockSpec((1, 4 * H), lambda: (0, 0)),
            pl.BlockSpec((T * H, FC_PAD), lambda: (0, 0)),
            pl.BlockSpec((1, FC_PAD), lambda: (0, 0)),
        ],
        out_specs=pl.BlockSpec((B, FC_PAD), lambda: (0, 0)),
        scratch_shapes=[
            pltpu.VMEM((B, T * H), jnp.float32),   # FC input slab
        ],
    )(x2d, k["wih0"], k["b0"], k["wblk"], k["b1"], k["wfc"], k["bfc"])

    # Drop the zero-padded classifier lanes.
    return out_pad[:, :NUM_CLASSES]


# ------------------------------ reference (pure JAX, f32) ---------------------
def lstm_model_reference(x, params):
    x = x.astype(jnp.float32)
    B = x.shape[0]
    h_seq = x
    for layer in range(NUM_LAYERS):
        p = params["lstm"][layer]
        H = p["w_hh_t"].shape[0]
        h = jnp.zeros((B, H), jnp.float32)
        c = jnp.zeros((B, H), jnp.float32)
        outs = []
        for t in range(h_seq.shape[1]):
            gates = h_seq[:, t, :] @ p["w_ih_t"] + h @ p["w_hh_t"] + p["bias"]
            i_g = jax.nn.sigmoid(gates[:, 0 * H:1 * H])
            f_g = jax.nn.sigmoid(gates[:, 1 * H:2 * H])
            g_g = jnp.tanh(gates[:, 2 * H:3 * H])
            o_g = jax.nn.sigmoid(gates[:, 3 * H:4 * H])
            c = f_g * c + i_g * g_g
            h = o_g * jnp.tanh(c)
            outs.append(h)
        h_seq = jnp.stack(outs, axis=1)  # (B, T, H)
    flat = h_seq.reshape(B, -1)
    return flat @ params["fc"]["w_t"] + params["fc"]["bias"]


# ------------------------------ param init ------------------------------------
def init_params(key):
    """PyTorch-style U(-1/sqrt(H), 1/sqrt(H)) init + kernel-side packing."""
    H = HIDDEN_SIZE
    bound = 1.0 / np.sqrt(H)
    layers = []
    for layer in range(NUM_LAYERS):
        in_dim = INPUT_SIZE if layer == 0 else H
        key, k1, k2, k3, k4 = jax.random.split(key, 5)
        w_ih = jax.random.uniform(k1, (4 * H, in_dim), jnp.float32, -bound, bound)
        w_hh = jax.random.uniform(k2, (4 * H, H), jnp.float32, -bound, bound)
        b_ih = jax.random.uniform(k3, (4 * H,), jnp.float32, -bound, bound)
        b_hh = jax.random.uniform(k4, (4 * H,), jnp.float32, -bound, bound)
        layers.append({
            "w_ih_t": w_ih.T,                 # (in, 4H)
            "w_hh_t": w_hh.T,                 # (H, 4H)
            "bias": (b_ih + b_hh)[None, :],   # (1, 4H)
        })

    fc_in = H * SEQ_LEN
    fc_bound = 1.0 / np.sqrt(fc_in)
    key, k1, k2 = jax.random.split(key, 3)
    w_fc = jax.random.uniform(k1, (NUM_CLASSES, fc_in), jnp.float32,
                              -fc_bound, fc_bound)
    b_fc = jax.random.uniform(k2, (NUM_CLASSES,), jnp.float32,
                              -fc_bound, fc_bound)

    params = {"lstm": layers,
              "fc": {"w_t": w_fc.T, "bias": b_fc[None, :]}}

    # ---- kernel-side packed / pre-scaled / bf16 weights ----
    # Tanh pre-scale per gate column (PyTorch gate order i, f, g, o):
    # 0.5 on sigmoid gates (i, f, o), 1.0 on the tanh gate (g), so that
    # sigmoid(z) = 0.5*tanh(0.5*z) + 0.5 needs only one tanh in the kernel.
    gate_scale = jnp.concatenate([
        jnp.full((H,), 0.5), jnp.full((H,), 0.5),
        jnp.full((H,), 1.0), jnp.full((H,), 0.5)]).astype(jnp.float32)

    p0, p1 = layers
    wih0_s = (p0["w_ih_t"] * gate_scale[None, :]).astype(jnp.bfloat16)  # (IN,4H)
    b0_s = (p0["bias"] * gate_scale[None, :]).astype(jnp.float32)       # (1,4H)
    b1_s = (p1["bias"] * gate_scale[None, :]).astype(jnp.float32)       # (1,4H)

    # Fused per-step recurrent weight (wavefront step):
    #   [h0_{t-1} | h1_{t-2}] @ [[W_hh0, W_ih1], [0, W_hh1]]
    col_scale = jnp.concatenate([gate_scale, gate_scale])               # (8H,)
    wblk = jnp.zeros((2 * H, 8 * H), jnp.float32)
    wblk = wblk.at[:H, :4 * H].set(p0["w_hh_t"])
    wblk = wblk.at[:H, 4 * H:].set(p1["w_ih_t"])
    wblk = wblk.at[H:, 4 * H:].set(p1["w_hh_t"])
    wblk_s = (wblk * col_scale[None, :]).astype(jnp.bfloat16)           # (2H,8H)

    # Lane-padded classifier (10 -> 128 output lanes) for a lane-dense store.
    wfc_pad = jnp.zeros((fc_in, FC_PAD), jnp.float32).at[:, :NUM_CLASSES].set(w_fc.T)
    bfc_pad = jnp.zeros((1, FC_PAD), jnp.float32).at[:, :NUM_CLASSES].set(b_fc[None, :])

    params["kernel"] = {
        "wih0": wih0_s, "b0": b0_s, "wblk": wblk_s, "b1": b1_s,
        "wfc": wfc_pad.astype(jnp.bfloat16), "bfc": bfc_pad,
    }
    return params


# ------------------------------ main -------------------------------------------
if __name__ == "__main__":
    key = jax.random.PRNGKey(0)
    key, kx, kp = jax.random.split(key, 3)

    x = jax.random.normal(kx, (BATCH, SEQ_LEN, INPUT_SIZE), jnp.float32)
    params = init_params(kp)

    out = lstm_model_forward(x, params)
    out = jax.block_until_ready(out)
    assert out.shape == (BATCH, NUM_CLASSES), out.shape

    ref = lstm_model_reference(x, params)
    # bf16 MXU operands in the 16-cell recurrence + FC -> slightly looser tol.
    np.testing.assert_allclose(np.asarray(out), np.asarray(ref),
                               rtol=2e-2, atol=2e-2)

    print("KERNEL_OK")
</pallas_src>

<mosaic_0001>
module attributes {stable_mosaic.version = 11 : i64} {
  func.func @fused_lstm_fc_kernel(%arg0: memref<8x128xf32, #tpu.memory_space<vmem>>, %arg1: memref<16x128xbf16, #tpu.memory_space<vmem>>, %arg2: memref<1x128xf32, #tpu.memory_space<vmem>>, %arg3: memref<64x256xbf16, #tpu.memory_space<vmem>>, %arg4: memref<1x128xf32, #tpu.memory_space<vmem>>, %arg5: memref<256x128xbf16, #tpu.memory_space<vmem>>, %arg6: memref<1x128xf32, #tpu.memory_space<vmem>>, %arg7: memref<8x128xf32, #tpu.memory_space<vmem>>, %arg8: memref<8x256xf32, #tpu.memory_space<vmem>>) attributes {dimension_semantics = [], scalar_prefetch = 0 : i64, scratch_operands = 1 : i64, tpu.core_type = #tpu.core_type<tc>} {
    %c0 = arith.constant 0 : index
    %c0_0 = arith.constant 0 : index
    %0 = vector.load %arg0[%c0, %c0_0] : memref<8x128xf32, #tpu.memory_space<vmem>>, vector<8x128xf32>
    %1 = arith.truncf %0 : vector<8x128xf32> to vector<8x128xbf16>
    %c0_1 = arith.constant 0 : index
    %c0_2 = arith.constant 0 : index
    %2 = vector.load %arg1[%c0_1, %c0_2] : memref<16x128xbf16, #tpu.memory_space<vmem>>, vector<16x128xbf16>
    %c0_3 = arith.constant 0 : index
    %c0_4 = arith.constant 0 : index
    %3 = vector.load %arg3[%c0_3, %c0_4] : memref<64x256xbf16, #tpu.memory_space<vmem>>, vector<64x256xbf16>
    %c0_5 = arith.constant 0 : index
    %c0_6 = arith.constant 0 : index
    %4 = vector.load %arg2[%c0_5, %c0_6] : memref<1x128xf32, #tpu.memory_space<vmem>>, vector<1x128xf32>
    %5 = vector.shape_cast %4 : vector<1x128xf32> to vector<1x128xf32>
    %6 = vector.broadcast %5 : vector<1x128xf32> to vector<8x128xf32>
    %c0_7 = arith.constant 0 : index
    %c0_8 = arith.constant 0 : index
    %7 = vector.load %arg4[%c0_7, %c0_8] : memref<1x128xf32, #tpu.memory_space<vmem>>, vector<1x128xf32>
    %8 = vector.shape_cast %7 : vector<1x128xf32> to vector<1x128xf32>
    %9 = vector.broadcast %8 : vector<1x128xf32> to vector<8x128xf32>
    %10 = tpu.iota {dimensions = array<i32: 1>} : vector<8x128xi32>
    %c64_i32 = arith.constant 64 : i32
    %11 = vector.broadcast %c64_i32 : i32 to vector<8x128xi32>
    %12 = arith.cmpi sge, %10, %11 : vector<8x128xi32>
    %c96_i32 = arith.constant 96 : i32
    %13 = vector.broadcast %c96_i32 : i32 to vector<8x128xi32>
    %14 = arith.cmpi slt, %10, %13 : vector<8x128xi32>
    %15 = arith.andi %12, %14 : vector<8x128xi1>
    %cst = arith.constant 1.000000e+00 : f32
    %cst_9 = arith.constant 5.000000e-01 : f32
    %16 = vector.broadcast %cst : f32 to vector<8x128xf32>
    %17 = vector.broadcast %cst_9 : f32 to vector<8x128xf32>
    %18 = arith.select %15, %16, %17 : vector<8x128xi1>, vector<8x128xf32>
    %cst_10 = arith.constant 0.000000e+00 : f32
    %cst_11 = arith.constant 5.000000e-01 : f32
    %19 = vector.broadcast %cst_10 : f32 to vector<8x128xf32>
    %20 = vector.broadcast %cst_11 : f32 to vector<8x128xf32>
    %21 = arith.select %15, %19, %20 : vector<8x128xi1>, vector<8x128xf32>
    %cst_12 = arith.constant 0.000000e+00 : f32
    %22 = vector.broadcast %cst_12 : f32 to vector<8x32xf32>
    %23 = vector.extract_strided_slice %1 {offsets = [0, 0], sizes = [8, 16], strides = [1, 1]} : vector<8x128xbf16> to vector<8x16xbf16>
    %cst_13 = arith.constant dense<0.000000e+00> : vector<8x128xf32>
    %24 = tpu.matmul %23, %2, %cst_13 {dimension_numbers = #tpu.dot_dimension_numbers<[1], [0], [0], [1], [0, 0, 1, 1], [], []>} : vector<8x16xbf16>, vector<16x128xbf16>, vector<8x128xf32> -> vector<8x128xf32>
    %25 = arith.addf %24, %6 : vector<8x128xf32>
    %26 = math.tanh %25 : vector<8x128xf32>
    %27 = arith.mulf %26, %18 : vector<8x128xf32>
    %28 = arith.addf %27, %21 : vector<8x128xf32>
    %29 = vector.extract_strided_slice %28 {offsets = [0, 0], sizes = [8, 32], strides = [1, 1]} : vector<8x128xf32> to vector<8x32xf32>
    %30 = vector.extract_strided_slice %28 {offsets = [0, 32], sizes = [8, 32], strides = [1, 1]} : vector<8x128xf32> to vector<8x32xf32>
    %31 = vector.extract_strided_slice %28 {offsets = [0, 64], sizes = [8, 32], strides = [1, 1]} : vector<8x128xf32> to vector<8x32xf32>
    %32 = vector.extract_strided_slice %28 {offsets = [0, 96], sizes = [8, 32], strides = [1, 1]} : vector<8x128xf32> to vector<8x32xf32>
    %33 = arith.mulf %30, %22 : vector<8x32xf32>
    %34 = arith.mulf %29, %31 : vector<8x32xf32>
    %35 = arith.addf %33, %34 : vector<8x32xf32>
    %36 = math.tanh %35 : vector<8x32xf32>
    %37 = arith.mulf %32, %36 : vector<8x32xf32>
    %38 = tpu.concatenate %37, %22 in 1 : vector<8x32xf32>, vector<8x32xf32> -> vector<8x64xf32>
    %39 = arith.truncf %38 : vector<8x64xf32> to vector<8x64xbf16>
    %cst_14 = arith.constant dense<0.000000e+00> : vector<8x256xf32>
    %40 = tpu.matmul %39, %3, %cst_14 {dimension_numbers = #tpu.dot_dimension_numbers<[1], [0], [0], [1], [0, 0, 1, 1], [], []>} : vector<8x64xbf16>, vector<64x256xbf16>, vector<8x256xf32> -> vector<8x256xf32>
    %41 = vector.extract_strided_slice %1 {offsets = [0, 16], sizes = [8, 16], strides = [1, 1]} : vector<8x128xbf16> to vector<8x16xbf16>
    %cst_15 = arith.constant dense<0.000000e+00> : vector<8x128xf32>
    %42 = tpu.matmul %41, %2, %cst_15 {dimension_numbers = #tpu.dot_dimension_numbers<[1], [0], [0], [1], [0, 0, 1, 1], [], []>} : vector<8x16xbf16>, vector<16x128xbf16>, vector<8x128xf32> -> vector<8x128xf32>
    %43 = arith.addf %42, %6 : vector<8x128xf32>
    %44 = vector.extract_strided_slice %40 {offsets = [0, 0], sizes = [8, 128], strides = [1, 1]} : vector<8x256xf32> to vector<8x128xf32>
    %45 = arith.addf %43, %44 : vector<8x128xf32>
    %46 = math.tanh %45 : vector<8x128xf32>
    %47 = arith.mulf %46, %18 : vector<8x128xf32>
    %48 = arith.addf %47, %21 : vector<8x128xf32>
    %49 = vector.extract_strided_slice %48 {offsets = [0, 0], sizes = [8, 32], strides = [1, 1]} : vector<8x128xf32> to vector<8x32xf32>
    %50 = vector.extract_strided_slice %48 {offsets = [0, 32], sizes = [8, 32], strides = [1, 1]} : vector<8x128xf32> to vector<8x32xf32>
    %51 = vector.extract_strided_slice %48 {offsets = [0, 64], sizes = [8, 32], strides = [1, 1]} : vector<8x128xf32> to vector<8x32xf32>
    %52 = vector.extract_strided_slice %48 {offsets = [0, 96], sizes = [8, 32], strides = [1, 1]} : vector<8x128xf32> to vector<8x32xf32>
    %53 = arith.mulf %50, %35 : vector<8x32xf32>
    %54 = arith.mulf %49, %51 : vector<8x32xf32>
    %55 = arith.addf %53, %54 : vector<8x32xf32>
    %56 = math.tanh %55 : vector<8x32xf32>
    %57 = arith.mulf %52, %56 : vector<8x32xf32>
    %58 = vector.extract_strided_slice %40 {offsets = [0, 128], sizes = [8, 128], strides = [1, 1]} : vector<8x256xf32> to vector<8x128xf32>
    %59 = arith.addf %58, %9 : vector<8x128xf32>
    %60 = math.tanh %59 : vector<8x128xf32>
    %61 = arith.mulf %60, %18 : vector<8x128xf32>
    %62 = arith.addf %61, %21 : vector<8x128xf32>
    %63 = vector.extract_strided_slice %62 {offsets = [0, 0], sizes = [8, 32], strides = [1, 1]} : vector<8x128xf32> to vector<8x32xf32>
    %64 = vector.extract_strided_slice %62 {offsets = [0, 32], sizes = [8, 32], strides = [1, 1]} : vector<8x128xf32> to vector<8x32xf32>
    %65 = vector.extract_strided_slice %62 {offsets = [0, 64], sizes = [8, 32], strides = [1, 1]} : vector<8x128xf32> to vector<8x32xf32>
    %66 = vector.extract_strided_slice %62 {offsets = [0, 96], sizes = [8, 32], strides = [1, 1]} : vector<8x128xf32> to vector<8x32xf32>
    %67 = arith.mulf %64, %22 : vector<8x32xf32>
    %68 = arith.mulf %63, %65 : vector<8x32xf32>
    %69 = arith.addf %67, %68 : vector<8x32xf32>
    %70 = math.tanh %69 : vector<8x32xf32>
    %71 = arith.mulf %66, %70 : vector<8x32xf32>
    %c0_16 = arith.constant 0 : index
    %c0_17 = arith.constant 0 : index
    %72 = vector.load %arg8[%c0_16, %c0_17] : memref<8x256xf32, #tpu.memory_space<vmem>>, vector<8x32xf32>
    tpu.vector_store %arg8[%c0_16, %c0_17], %71 {strides = array<i32>} : memref<8x256xf32, #tpu.memory_space<vmem>>, vector<8x32xf32>,
    %73 = tpu.concatenate %57, %71 in 1 : vector<8x32xf32>, vector<8x32xf32> -> vector<8x64xf32>
    %74 = arith.truncf %73 : vector<8x64xf32> to vector<8x64xbf16>
    %cst_18 = arith.constant dense<0.000000e+00> : vector<8x256xf32>
    %75 = tpu.matmul %74, %3, %cst_18 {dimension_numbers = #tpu.dot_dimension_numbers<[1], [0], [0], [1], [0, 0, 1, 1], [], []>} : vector<8x64xbf16>, vector<64x256xbf16>, vector<8x256xf32> -> vector<8x256xf32>
    %76 = vector.extract_strided_slice %1 {offsets = [0, 32], sizes = [8, 16], strides = [1, 1]} : vector<8x128xbf16> to vector<8x16xbf16>
    %cst_19 = arith.constant dense<0.000000e+00> : vector<8x128xf32>
    %77 = tpu.matmul %76, %2, %cst_19 {dimension_numbers = #tpu.dot_dimension_numbers<[1], [0], [0], [1], [0, 0, 1, 1], [], []>} : vector<8x16xbf16>, vector<16x128xbf16>, vector<8x128xf32> -> vector<8x128xf32>
    %78 = arith.addf %77, %6 : vector<8x128xf32>
    %79 = vector.extract_strided_slice %75 {offsets = [0, 0], sizes = [8, 128], strides = [1, 1]} : vector<8x256xf32> to vector<8x128xf32>
    %80 = arith.addf %78, %79 : vector<8x128xf32>
    %81 = math.tanh %80 : vector<8x128xf32>
    %82 = arith.mulf %81, %18 : vector<8x128xf32>
    %83 = arith.addf %82, %21 : vector<8x128xf32>
    %84 = vector.extract_strided_slice %83 {offsets = [0, 0], sizes = [8, 32], strides = [1, 1]} : vector<8x128xf32> to vector<8x32xf32>
    %85 = vector.extract_strided_slice %83 {offsets = [0, 32], sizes = [8, 32], strides = [1, 1]} : vector<8x128xf32> to vector<8x32xf32>
    %86 = vector.extract_strided_slice %83 {offsets = [0, 64], sizes = [8, 32], strides = [1, 1]} : vector<8x128xf32> to vector<8x32xf32>
    %87 = vector.extract_strided_slice %83 {offsets = [0, 96], sizes = [8, 32], strides = [1, 1]} : vector<8x128xf32> to vector<8x32xf32>
    %88 = arith.mulf %85, %55 : vector<8x32xf32>
    %89 = arith.mulf %84, %86 : vector<8x32xf32>
    %90 = arith.addf %88, %89 : vector<8x32xf32>
    %91 = math.tanh %90 : vector<8x32xf32>
    %92 = arith.mulf %87, %91 : vector<8x32xf32>
    %93 = vector.extract_strided_slice %75 {offsets = [0, 128], sizes = [8, 128], strides = [1, 1]} : vector<8x256xf32> to vector<8x128xf32>
    %94 = arith.addf %93, %9 : vector<8x128xf32>
    %95 = math.tanh %94 : vector<8x128xf32>
    %96 = arith.mulf %95, %18 : vector<8x128xf32>
    %97 = arith.addf %96, %21 : vector<8x128xf32>
    %98 = vector.extract_strided_slice %97 {offsets = [0, 0], sizes = [8, 32], strides = [1, 1]} : vector<8x128xf32> to vector<8x32xf32>
    %99 = vector.extract_strided_slice %97 {offsets = [0, 32], sizes = [8, 32], strides = [1, 1]} : vector<8x128xf32> to vector<8x32xf32>
    %100 = vector.extract_strided_slice %97 {offsets = [0, 64], sizes = [8, 32], strides = [1, 1]} : vector<8x128xf32> to vector<8x32xf32>
    %101 = vector.extract_strided_slice %97 {offsets = [0, 96], sizes = [8, 32], strides = [1, 1]} : vector<8x128xf32> to vector<8x32xf32>
    %102 = arith.mulf %99, %69 : vector<8x32xf32>
    %103 = arith.mulf %98, %100 : vector<8x32xf32>
    %104 = arith.addf %102, %103 : vector<8x32xf32>
    %105 = math.tanh %104 : vector<8x32xf32>
    %106 = arith.mulf %101, %105 : vector<8x32xf32>
    %c0_20 = arith.constant 0 : index
    %c32 = arith.constant 32 : index
    %107 = vector.load %arg8[%c0_20, %c32] : memref<8x256xf32, #tpu.memory_space<vmem>>, vector<8x32xf32>
    tpu.vector_store %arg8[%c0_20, %c32], %106 {strides = array<i32>} : memref<8x256xf32, #tpu.memory_space<vmem>>, vector<8x32xf32>,
    %108 = tpu.concatenate %92, %106 in 1 : vector<8x32xf32>, vector<8x32xf32> -> vector<8x64xf32>
    %109 = arith.truncf %108 : vector<8x64xf32> to vector<8x64xbf16>
    %cst_21 = arith.constant dense<0.000000e+00> : vector<8x256xf32>
    %110 = tpu.matmul %109, %3, %cst_21 {dimension_numbers = #tpu.dot_dimension_numbers<[1], [0], [0], [1], [0, 0, 1, 1], [], []>} : vector<8x64xbf16>, vector<64x256xbf16>, vector<8x256xf32> -> vector<8x256xf32>
    %111 = vector.extract_strided_slice %1 {offsets = [0, 48], sizes = [8, 16], strides = [1, 1]} : vector<8x128xbf16> to vector<8x16xbf16>
    %cst_22 = arith.constant dense<0.000000e+00> : vector<8x128xf32>
    %112 = tpu.matmul %111, %2, %cst_22 {dimension_numbers = #tpu.dot_dimension_numbers<[1], [0], [0], [1], [0, 0, 1, 1], [], []>} : vector<8x16xbf16>, vector<16x128xbf16>, vector<8x128xf32> -> vector<8x128xf32>
    %113 = arith.addf %112, %6 : vector<8x128xf32>
    %114 = vector.extract_strided_slice %110 {offsets = [0, 0], sizes = [8, 128], strides = [1, 1]} : vector<8x256xf32> to vector<8x128xf32>
    %115 = arith.addf %113, %114 : vector<8x128xf32>
    %116 = math.tanh %115 : vector<8x128xf32>
    %117 = arith.mulf %116, %18 : vector<8x128xf32>
    %118 = arith.addf %117, %21 : vector<8x128xf32>
    %119 = vector.extract_strided_slice %118 {offsets = [0, 0], sizes = [8, 32], strides = [1, 1]} : vector<8x128xf32> to vector<8x32xf32>
    %120 = vector.extract_strided_slice %118 {offsets = [0, 32], sizes = [8, 32], strides = [1, 1]} : vector<8x128xf32> to vector<8x32xf32>
    %121 = vector.extract_strided_slice %118 {offsets = [0, 64], sizes = [8, 32], strides = [1, 1]} : vector<8x128xf32> to vector<8x32xf32>
    %122 = vector.extract_strided_slice %118 {offsets = [0, 96], sizes = [8, 32], strides = [1, 1]} : vector<8x128xf32> to vector<8x32xf32>
    %123 = arith.mulf %120, %90 : vector<8x32xf32>
    %124 = arith.mulf %119, %121 : vector<8x32xf32>
    %125 = arith.addf %123, %124 : vector<8x32xf32>
    %126 = math.tanh %125 : vector<8x32xf32>
    %127 = arith.mulf %122, %126 : vector<8x32xf32>
    %128 = vector.extract_strided_slice %110 {offsets = [0, 128], sizes = [8, 128], strides = [1, 1]} : vector<8x256xf32> to vector<8x128xf32>
    %129 = arith.addf %128, %9 : vector<8x128xf32>
    %130 = math.tanh %129 : vector<8x128xf32>
    %131 = arith.mulf %130, %18 : vector<8x128xf32>
    %132 = arith.addf %131, %21 : vector<8x128xf32>
    %133 = vector.extract_strided_slice %132 {offsets = [0, 0], sizes = [8, 32], strides = [1, 1]} : vector<8x128xf32> to vector<8x32xf32>
    %134 = vector.extract_strided_slice %132 {offsets = [0, 32], sizes = [8, 32], strides = [1, 1]} : vector<8x128xf32> to vector<8x32xf32>
    %135 = vector.extract_strided_slice %132 {offsets = [0, 64], sizes = [8, 32], strides = [1, 1]} : vector<8x128xf32> to vector<8x32xf32>
    %136 = vector.extract_strided_slice %132 {offsets = [0, 96], sizes = [8, 32], strides = [1, 1]} : vector<8x128xf32> to vector<8x32xf32>
    %137 = arith.mulf %134, %104 : vector<8x32xf32>
    %138 = arith.mulf %133, %135 : vector<8x32xf32>
    %139 = arith.addf %137, %138 : vector<8x32xf32>
    %140 = math.tanh %139 : vector<8x32xf32>
    %141 = arith.mulf %136, %140 : vector<8x32xf32>
    %c0_23 = arith.constant 0 : index
    %c64 = arith.constant 64 : index
    %142 = vector.load %arg8[%c0_23, %c64] : memref<8x256xf32, #tpu.memory_space<vmem>>, vector<8x32xf32>
    tpu.vector_store %arg8[%c0_23, %c64], %141 {strides = array<i32>} : memref<8x256xf32, #tpu.memory_space<vmem>>, vector<8x32xf32>,
    %143 = tpu.concatenate %127, %141 in 1 : vector<8x32xf32>, vector<8x32xf32> -> vector<8x64xf32>
    %144 = arith.truncf %143 : vector<8x64xf32> to vector<8x64xbf16>
    %cst_24 = arith.constant dense<0.000000e+00> : vector<8x256xf32>
    %145 = tpu.matmul %144, %3, %cst_24 {dimension_numbers = #tpu.dot_dimension_numbers<[1], [0], [0], [1], [0, 0, 1, 1], [], []>} : vector<8x64xbf16>, vector<64x256xbf16>, vector<8x256xf32> -> vector<8x256xf32>
    %146 = vector.extract_strided_slice %1 {offsets = [0, 64], sizes = [8, 16], strides = [1, 1]} : vector<8x128xbf16> to vector<8x16xbf16>
    %cst_25 = arith.constant dense<0.000000e+00> : vector<8x128xf32>
    %147 = tpu.matmul %146, %2, %cst_25 {dimension_numbers = #tpu.dot_dimension_numbers<[1], [0], [0], [1], [0, 0, 1, 1], [], []>} : vector<8x16xbf16>, vector<16x128xbf16>, vector<8x128xf32> -> vector<8x128xf32>
    %148 = arith.addf %147, %6 : vector<8x128xf32>
    %149 = vector.extract_strided_slice %145 {offsets = [0, 0], sizes = [8, 128], strides = [1, 1]} : vector<8x256xf32> to vector<8x128xf32>
    %150 = arith.addf %148, %149 : vector<8x128xf32>
    %151 = math.tanh %150 : vector<8x128xf32>
    %152 = arith.mulf %151, %18 : vector<8x128xf32>
    %153 = arith.addf %152, %21 : vector<8x128xf32>
    %154 = vector.extract_strided_slice %153 {offsets = [0, 0], sizes = [8, 32], strides = [1, 1]} : vector<8x128xf32> to vector<8x32xf32>
    %155 = vector.extract_strided_slice %153 {offsets = [0, 32], sizes = [8, 32], strides = [1, 1]} : vector<8x128xf32> to vector<8x32xf32>
    %156 = vector.extract_strided_slice %153 {offsets = [0, 64], sizes = [8, 32], strides = [1, 1]} : vector<8x128xf32> to vector<8x32xf32>
    %157 = vector.extract_strided_slice %153 {offsets = [0, 96], sizes = [8, 32], strides = [1, 1]} : vector<8x128xf32> to vector<8x32xf32>
    %158 = arith.mulf %155, %125 : vector<8x32xf32>
    %159 = arith.mulf %154, %156 : vector<8x32xf32>
    %160 = arith.addf %158, %159 : vector<8x32xf32>
    %161 = math.tanh %160 : vector<8x32xf32>
    %162 = arith.mulf %157, %161 : vector<8x32xf32>
    %163 = vector.extract_strided_slice %145 {offsets = [0, 128], sizes = [8, 128], strides = [1, 1]} : vector<8x256xf32> to vector<8x128xf32>
    %164 = arith.addf %163, %9 : vector<8x128xf32>
    %165 = math.tanh %164 : vector<8x128xf32>
    %166 = arith.mulf %165, %18 : vector<8x128xf32>
    %167 = arith.addf %166, %21 : vector<8x128xf32>
    %168 = vector.extract_strided_slice %167 {offsets = [0, 0], sizes = [8, 32], strides = [1, 1]} : vector<8x128xf32> to vector<8x32xf32>
    %169 = vector.extract_strided_slice %167 {offsets = [0, 32], sizes = [8, 32], strides = [1, 1]} : vector<8x128xf32> to vector<8x32xf32>
    %170 = vector.extract_strided_slice %167 {offsets = [0, 64], sizes = [8, 32], strides = [1, 1]} : vector<8x128xf32> to vector<8x32xf32>
    %171 = vector.extract_strided_slice %167 {offsets = [0, 96], sizes = [8, 32], strides = [1, 1]} : vector<8x128xf32> to vector<8x32xf32>
    %172 = arith.mulf %169, %139 : vector<8x32xf32>
    %173 = arith.mulf %168, %170 : vector<8x32xf32>
    %174 = arith.addf %172, %173 : vector<8x32xf32>
    %175 = math.tanh %174 : vector<8x32xf32>
    %176 = arith.mulf %171, %175 : vector<8x32xf32>
    %c0_26 = arith.constant 0 : index
    %c96 = arith.constant 96 : index
    %177 = vector.load %arg8[%c0_26, %c96] : memref<8x256xf32, #tpu.memory_space<vmem>>, vector<8x32xf32>
    tpu.vector_store %arg8[%c0_26, %c96], %176 {strides = array<i32>} : memref<8x256xf32, #tpu.memory_space<vmem>>, vector<8x32xf32>,
    %178 = tpu.concatenate %162, %176 in 1 : vector<8x32xf32>, vector<8x32xf32> -> vector<8x64xf32>
    %179 = arith.truncf %178 : vector<8x64xf32> to vector<8x64xbf16>
    %cst_27 = arith.constant dense<0.000000e+00> : vector<8x256xf32>
    %180 = tpu.matmul %179, %3, %cst_27 {dimension_numbers = #tpu.dot_dimension_numbers<[1], [0], [0], [1], [0, 0, 1, 1], [], []>} : vector<8x64xbf16>, vector<64x256xbf16>, vector<8x256xf32> -> vector<8x256xf32>
    %181 = vector.extract_strided_slice %1 {offsets = [0, 80], sizes = [8, 16], strides = [1, 1]} : vector<8x128xbf16> to vector<8x16xbf16>
    %cst_28 = arith.constant dense<0.000000e+00> : vector<8x128xf32>
    %182 = tpu.matmul %181, %2, %cst_28 {dimension_numbers = #tpu.dot_dimension_numbers<[1], [0], [0], [1], [0, 0, 1, 1], [], []>} : vector<8x16xbf16>, vector<16x128xbf16>, vector<8x128xf32> -> vector<8x128xf32>
    %183 = arith.addf %182, %6 : vector<8x128xf32>
    %184 = vector.extract_strided_slice %180 {offsets = [0, 0], sizes = [8, 128], strides = [1, 1]} : vector<8x256xf32> to vector<8x128xf32>
    %185 = arith.addf %183, %184 : vector<8x128xf32>
    %186 = math.tanh %185 : vector<8x128xf32>
    %187 = arith.mulf %186, %18 : vector<8x128xf32>
    %188 = arith.addf %187, %21 : vector<8x128xf32>
    %189 = vector.extract_strided_slice %188 {offsets = [0, 0], sizes = [8, 32], strides = [1, 1]} : vector<8x128xf32> to vector<8x32xf32>
    %190 = vector.extract_strided_slice %188 {offsets = [0, 32], sizes = [8, 32], strides = [1, 1]} : vector<8x128xf32> to vector<8x32xf32>
    %191 = vector.extract_strided_slice %188 {offsets = [0, 64], sizes = [8, 32], strides = [1, 1]} : vector<8x128xf32> to vector<8x32xf32>
    %192 = vector.extract_strided_slice %188 {offsets = [0, 96], sizes = [8, 32], strides = [1, 1]} : vector<8x128xf32> to vector<8x32xf32>
    %193 = arith.mulf %190, %160 : vector<8x32xf32>
    %194 = arith.mulf %189, %191 : vector<8x32xf32>
    %195 = arith.addf %193, %194 : vector<8x32xf32>
    %196 = math.tanh %195 : vector<8x32xf32>
    %197 = arith.mulf %192, %196 : vector<8x32xf32>
    %198 = vector.extract_strided_slice %180 {offsets = [0, 128], sizes = [8, 128], strides = [1, 1]} : vector<8x256xf32> to vector<8x128xf32>
    %199 = arith.addf %198, %9 : vector<8x128xf32>
    %200 = math.tanh %199 : vector<8x128xf32>
    %201 = arith.mulf %200, %18 : vector<8x128xf32>
    %202 = arith.addf %201, %21 : vector<8x128xf32>
    %203 = vector.extract_strided_slice %202 {offsets = [0, 0], sizes = [8, 32], strides = [1, 1]} : vector<8x128xf32> to vector<8x32xf32>
    %204 = vector.extract_strided_slice %202 {offsets = [0, 32], sizes = [8, 32], strides = [1, 1]} : vector<8x128xf32> to vector<8x32xf32>
    %205 = vector.extract_strided_slice %202 {offsets = [0, 64], sizes = [8, 32], strides = [1, 1]} : vector<8x128xf32> to vector<8x32xf32>
    %206 = vector.extract_strided_slice %202 {offsets = [0, 96], sizes = [8, 32], strides = [1, 1]} : vector<8x128xf32> to vector<8x32xf32>
    %207 = arith.mulf %204, %174 : vector<8x32xf32>
    %208 = arith.mulf %203, %205 : vector<8x32xf32>
    %209 = arith.addf %207, %208 : vector<8x32xf32>
    %210 = math.tanh %209 : vector<8x32xf32>
    %211 = arith.mulf %206, %210 : vector<8x32xf32>
    %c0_29 = arith.constant 0 : index
    %c128 = arith.constant 128 : index
    %212 = vector.load %arg8[%c0_29, %c128] : memref<8x256xf32, #tpu.memory_space<vmem>>, vector<8x32xf32>
    tpu.vector_store %arg8[%c0_29, %c128], %211 {strides = array<i32>} : memref<8x256xf32, #tpu.memory_space<vmem>>, vector<8x32xf32>,
    %213 = tpu.concatenate %197, %211 in 1 : vector<8x32xf32>, vector<8x32xf32> -> vector<8x64xf32>
    %214 = arith.truncf %213 : vector<8x64xf32> to vector<8x64xbf16>
    %cst_30 = arith.constant dense<0.000000e+00> : vector<8x256xf32>
    %215 = tpu.matmul %214, %3, %cst_30 {dimension_numbers = #tpu.dot_dimension_numbers<[1], [0], [0], [1], [0, 0, 1, 1], [], []>} : vector<8x64xbf16>, vector<64x256xbf16>, vector<8x256xf32> -> vector<8x256xf32>
    %216 = vector.extract_strided_slice %1 {offsets = [0, 96], sizes = [8, 16], strides = [1, 1]} : vector<8x128xbf16> to vector<8x16xbf16>
    %cst_31 = arith.constant dense<0.000000e+00> : vector<8x128xf32>
    %217 = tpu.matmul %216, %2, %cst_31 {dimension_numbers = #tpu.dot_dimension_numbers<[1], [0], [0], [1], [0, 0, 1, 1], [], []>} : vector<8x16xbf16>, vector<16x128xbf16>, vector<8x128xf32> -> vector<8x128xf32>
    %218 = arith.addf %217, %6 : vector<8x128xf32>
    %219 = vector.extract_strided_slice %215 {offsets = [0, 0], sizes = [8, 128], strides = [1, 1]} : vector<8x256xf32> to vector<8x128xf32>
    %220 = arith.addf %218, %219 : vector<8x128xf32>
    %221 = math.tanh %220 : vector<8x128xf32>
    %222 = arith.mulf %221, %18 : vector<8x128xf32>
    %223 = arith.addf %222, %21 : vector<8x128xf32>
    %224 = vector.extract_strided_slice %223 {offsets = [0, 0], sizes = [8, 32], strides = [1, 1]} : vector<8x128xf32> to vector<8x32xf32>
    %225 = vector.extract_strided_slice %223 {offsets = [0, 32], sizes = [8, 32], strides = [1, 1]} : vector<8x128xf32> to vector<8x32xf32>
    %226 = vector.extract_strided_slice %223 {offsets = [0, 64], sizes = [8, 32], strides = [1, 1]} : vector<8x128xf32> to vector<8x32xf32>
    %227 = vector.extract_strided_slice %223 {offsets = [0, 96], sizes = [8, 32], strides = [1, 1]} : vector<8x128xf32> to vector<8x32xf32>
    %228 = arith.mulf %225, %195 : vector<8x32xf32>
    %229 = arith.mulf %224, %226 : vector<8x32xf32>
    %230 = arith.addf %228, %229 : vector<8x32xf32>
    %231 = math.tanh %230 : vector<8x32xf32>
    %232 = arith.mulf %227, %231 : vector<8x32xf32>
    %233 = vector.extract_strided_slice %215 {offsets = [0, 128], sizes = [8, 128], strides = [1, 1]} : vector<8x256xf32> to vector<8x128xf32>
    %234 = arith.addf %233, %9 : vector<8x128xf32>
    %235 = math.tanh %234 : vector<8x128xf32>
    %236 = arith.mulf %235, %18 : vector<8x128xf32>
    %237 = arith.addf %236, %21 : vector<8x128xf32>
    %238 = vector.extract_strided_slice %237 {offsets = [0, 0], sizes = [8, 32], strides = [1, 1]} : vector<8x128xf32> to vector<8x32xf32>
    %239 = vector.extract_strided_slice %237 {offsets = [0, 32], sizes = [8, 32], strides = [1, 1]} : vector<8x128xf32> to vector<8x32xf32>
    %240 = vector.extract_strided_slice %237 {offsets = [0, 64], sizes = [8, 32], strides = [1, 1]} : vector<8x128xf32> to vector<8x32xf32>
    %241 = vector.extract_strided_slice %237 {offsets = [0, 96], sizes = [8, 32], strides = [1, 1]} : vector<8x128xf32> to vector<8x32xf32>
    %242 = arith.mulf %239, %209 : vector<8x32xf32>
    %243 = arith.mulf %238, %240 : vector<8x32xf32>
    %244 = arith.addf %242, %243 : vector<8x32xf32>
    %245 = math.tanh %244 : vector<8x32xf32>
    %246 = arith.mulf %241, %245 : vector<8x32xf32>
    %c0_32 = arith.constant 0 : index
    %c160 = arith.constant 160 : index
    %247 = vector.load %arg8[%c0_32, %c160] : memref<8x256xf32, #tpu.memory_space<vmem>>, vector<8x32xf32>
    tpu.vector_store %arg8[%c0_32, %c160], %246 {strides = array<i32>} : memref<8x256xf32, #tpu.memory_space<vmem>>, vector<8x32xf32>,
    %248 = tpu.concatenate %232, %246 in 1 : vector<8x32xf32>, vector<8x32xf32> -> vector<8x64xf32>
    %249 = arith.truncf %248 : vector<8x64xf32> to vector<8x64xbf16>
    %cst_33 = arith.constant dense<0.000000e+00> : vector<8x256xf32>
    %250 = tpu.matmul %249, %3, %cst_33 {dimension_numbers = #tpu.dot_dimension_numbers<[1], [0], [0], [1], [0, 0, 1, 1], [], []>} : vector<8x64xbf16>, vector<64x256xbf16>, vector<8x256xf32> -> vector<8x256xf32>
    %251 = vector.extract_strided_slice %1 {offsets = [0, 112], sizes = [8, 16], strides = [1, 1]} : vector<8x128xbf16> to vector<8x16xbf16>
    %cst_34 = arith.constant dense<0.000000e+00> : vector<8x128xf32>
    %252 = tpu.matmul %251, %2, %cst_34 {dimension_numbers = #tpu.dot_dimension_numbers<[1], [0], [0], [1], [0, 0, 1, 1], [], []>} : vector<8x16xbf16>, vector<16x128xbf16>, vector<8x128xf32> -> vector<8x128xf32>
    %253 = arith.addf %252, %6 : vector<8x128xf32>
    %254 = vector.extract_strided_slice %250 {offsets = [0, 0], sizes = [8, 128], strides = [1, 1]} : vector<8x256xf32> to vector<8x128xf32>
    %255 = arith.addf %253, %254 : vector<8x128xf32>
    %256 = math.tanh %255 : vector<8x128xf32>
    %257 = arith.mulf %256, %18 : vector<8x128xf32>
    %258 = arith.addf %257, %21 : vector<8x128xf32>
    %259 = vector.extract_strided_slice %258 {offsets = [0, 0], sizes = [8, 32], strides = [1, 1]} : vector<8x128xf32> to vector<8x32xf32>
    %260 = vector.extract_strided_slice %258 {offsets = [0, 32], sizes = [8, 32], strides = [1, 1]} : vector<8x128xf32> to vector<8x32xf32>
    %261 = vector.extract_strided_slice %258 {offsets = [0, 64], sizes = [8, 32], strides = [1, 1]} : vector<8x128xf32> to vector<8x32xf32>
    %262 = vector.extract_strided_slice %258 {offsets = [0, 96], sizes = [8, 32], strides = [1, 1]} : vector<8x128xf32> to vector<8x32xf32>
    %263 = arith.mulf %260, %230 : vector<8x32xf32>
    %264 = arith.mulf %259, %261 : vector<8x32xf32>
    %265 = arith.addf %263, %264 : vector<8x32xf32>
    %266 = math.tanh %265 : vector<8x32xf32>
    %267 = arith.mulf %262, %266 : vector<8x32xf32>
    %268 = vector.extract_strided_slice %250 {offsets = [0, 128], sizes = [8, 128], strides = [1, 1]} : vector<8x256xf32> to vector<8x128xf32>
    %269 = arith.addf %268, %9 : vector<8x128xf32>
    %270 = math.tanh %269 : vector<8x128xf32>
    %271 = arith.mulf %270, %18 : vector<8x128xf32>
    %272 = arith.addf %271, %21 : vector<8x128xf32>
    %273 = vector.extract_strided_slice %272 {offsets = [0, 0], sizes = [8, 32], strides = [1, 1]} : vector<8x128xf32> to vector<8x32xf32>
    %274 = vector.extract_strided_slice %272 {offsets = [0, 32], sizes = [8, 32], strides = [1, 1]} : vector<8x128xf32> to vector<8x32xf32>
    %275 = vector.extract_strided_slice %272 {offsets = [0, 64], sizes = [8, 32], strides = [1, 1]} : vector<8x128xf32> to vector<8x32xf32>
    %276 = vector.extract_strided_slice %272 {offsets = [0, 96], sizes = [8, 32], strides = [1, 1]} : vector<8x128xf32> to vector<8x32xf32>
    %277 = arith.mulf %274, %244 : vector<8x32xf32>
    %278 = arith.mulf %273, %275 : vector<8x32xf32>
    %279 = arith.addf %277, %278 : vector<8x32xf32>
    %280 = math.tanh %279 : vector<8x32xf32>
    %281 = arith.mulf %276, %280 : vector<8x32xf32>
    %c0_35 = arith.constant 0 : index
    %c192 = arith.constant 192 : index
    %282 = vector.load %arg8[%c0_35, %c192] : memref<8x256xf32, #tpu.memory_space<vmem>>, vector<8x32xf32>
    tpu.vector_store %arg8[%c0_35, %c192], %281 {strides = array<i32>} : memref<8x256xf32, #tpu.memory_space<vmem>>, vector<8x32xf32>,
    %283 = tpu.concatenate %267, %281 in 1 : vector<8x32xf32>, vector<8x32xf32> -> vector<8x64xf32>
    %284 = arith.truncf %283 : vector<8x64xf32> to vector<8x64xbf16>
    %cst_36 = arith.constant dense<0.000000e+00> : vector<8x256xf32>
    %285 = tpu.matmul %284, %3, %cst_36 {dimension_numbers = #tpu.dot_dimension_numbers<[1], [0], [0], [1], [0, 0, 1, 1], [], []>} : vector<8x64xbf16>, vector<64x256xbf16>, vector<8x256xf32> -> vector<8x256xf32>
    %286 = vector.extract_strided_slice %285 {offsets = [0, 128], sizes = [8, 128], strides = [1, 1]} : vector<8x256xf32> to vector<8x128xf32>
    %287 = arith.addf %286, %9 : vector<8x128xf32>
    %288 = math.tanh %287 : vector<8x128xf32>
    %289 = arith.mulf %288, %18 : vector<8x128xf32>
    %290 = arith.addf %289, %21 : vector<8x128xf32>
    %291 = vector.extract_strided_slice %290 {offsets = [0, 0], sizes = [8, 32], strides = [1, 1]} : vector<8x128xf32> to vector<8x32xf32>
    %292 = vector.extract_strided_slice %290 {offsets = [0, 32], sizes = [8, 32], strides = [1, 1]} : vector<8x128xf32> to vector<8x32xf32>
    %293 = vector.extract_strided_slice %290 {offsets = [0, 64], sizes = [8, 32], strides = [1, 1]} : vector<8x128xf32> to vector<8x32xf32>
    %294 = vector.extract_strided_slice %290 {offsets = [0, 96], sizes = [8, 32], strides = [1, 1]} : vector<8x128xf32> to vector<8x32xf32>
    %295 = arith.mulf %292, %279 : vector<8x32xf32>
    %296 = arith.mulf %291, %293 : vector<8x32xf32>
    %297 = arith.addf %295, %296 : vector<8x32xf32>
    %298 = math.tanh %297 : vector<8x32xf32>
    %299 = arith.mulf %294, %298 : vector<8x32xf32>
    %c0_37 = arith.constant 0 : index
    %c224 = arith.constant 224 : index
    %300 = vector.load %arg8[%c0_37, %c224] : memref<8x256xf32, #tpu.memory_space<vmem>>, vector<8x32xf32>
    tpu.vector_store %arg8[%c0_37, %c224], %299 {strides = array<i32>} : memref<8x256xf32, #tpu.memory_space<vmem>>, vector<8x32xf32>,
    %c0_38 = arith.constant 0 : index
    %c0_39 = arith.constant 0 : index
    %301 = vector.load %arg8[%c0_38, %c0_39] : memref<8x256xf32, #tpu.memory_space<vmem>>, vector<8x256xf32>
    %302 = arith.truncf %301 : vector<8x256xf32> to vector<8x256xbf16>
    %c0_40 = arith.constant 0 : index
    %c0_41 = arith.constant 0 : index
    %303 = vector.load %arg5[%c0_40, %c0_41] : memref<256x128xbf16, #tpu.memory_space<vmem>>, vector<256x128xbf16>
    %cst_42 = arith.constant dense<0.000000e+00> : vector<8x128xf32>
    %304 = tpu.matmul %302, %303, %cst_42 {dimension_numbers = #tpu.dot_dimension_numbers<[1], [0], [0], [1], [0, 0, 1, 1], [], []>} : vector<8x256xbf16>, vector<256x128xbf16>, vector<8x128xf32> -> vector<8x128xf32>
    %c0_43 = arith.constant 0 : index
    %c0_44 = arith.constant 0 : index
    %305 = vector.load %arg6[%c0_43, %c0_44] : memref<1x128xf32, #tpu.memory_space<vmem>>, vector<1x128xf32>
    %306 = vector.broadcast %305 : vector<1x128xf32> to vector<8x128xf32>
    %307 = arith.addf %304, %306 : vector<8x128xf32>
    %c0_45 = arith.constant 0 : index
    %c0_46 = arith.constant 0 : index
    %308 = vector.load %arg7[%c0_45, %c0_46] : memref<8x128xf32, #tpu.memory_space<vmem>>, vector<8x128xf32>
    tpu.vector_store %arg7[%c0_45, %c0_46], %307 {strides = array<i32>} : memref<8x128xf32, #tpu.memory_space<vmem>>, vector<8x128xf32>,
    return
  }
}

</mosaic_0001>

<bundles_post_ra>
// kernel: lstm_model_forward.1
= control target key start
LH: loop header
LB: loop body
LE: loop exit
PB: predicated region body
PF: predicated region fallthrough
CT: control target
= control target key end

     0   :  { %12 = vsyncpa [#allocation4], 0  ;;  %s2199_s0 = inlined_call_operand.vmem [shape: f32[8,128], index: 0, kind: input, shape index: {}]   ;;  %s2200_s1 = inlined_call_operand.vmem [shape: bf16[16,128], index: 1, kind: input, shape index: {}]   ;;  %s2201_s2 = inlined_call_operand.vmem [shape: f32[1,128], index: 2, kind: input, shape index: {}]   ;;  %s2202_s3 = inlined_call_operand.vmem [shape: bf16[64,256], index: 3, kind: input, shape index: {}]   ;;  %s2203_s4 = inlined_call_operand.vmem [shape: f32[1,128], index: 4, kind: input, shape index: {}]   ;;  %s2204_s5 = inlined_call_operand.hbm [shape: bf16[256,128], index: 5, kind: input, shape index: {}]   ;;  %s2205_s6 = inlined_call_operand.vmem [shape: f32[1,128], index: 6, kind: input, shape index: {}]   ;;  %s2206_s7 = inlined_call_operand.hbm [shape: f32[8,128], index: 7, kind: output, shape index: {}]  }
   0x1   :  { %13 = vsyncpa [#allocation5], 0  ;;  %s1748_s24 = smov [#allocation3]   ;;  %s1700_s28 = scalar_lea.hbm %s2204_s5, 2048 }
   0x2   :  { %s29_s25 = sshll.u32 %s1748_s24, 4  ;;  %p1701_p0 = scmp.ne.s32.totalorder %s2204_s5, %s1700_s28  ;;  %s30_s25 = int_to_ptr.vmem [resolvable:$true] %s29_s25 }
   0x3   :  { %p1704_p1 = scmp.lt.u32.totalorder %s1700_s28, %s2204_s5 }
   0x5   :  { %p1706_p2 = pnand %p1704_p1, %p1701_p0 }
   0x7   :  { %1709 = shalt.err (!%p1706_p2)
}
   0x8   :  { %s1710_s10 = scalar_lea.vmem %s30_s25, 2048  ;;  %p1715_p4 = scmp.lt.s32.totalorder %s30_s25, %s30_s25 }
   0x9   :  { %p1711_p3 = scmp.ne.s32.totalorder %s30_s25, %s1710_s10  ;;  %p1716_p5 = scmp.lt.s32.totalorder %s1710_s10, %s1710_s10 }
   0xb   :  { %p1717_p6 = por %p1716_p5, %p1715_p4 }
   0xd   :  { %p1718_p7 = pnand %p1717_p6, %p1711_p3 }
   0xf   :  { %1721 = shalt.err (!%p1718_p7)
}
  0x10   :  { %s1749_s11 = smov 64   ;;  %s1750_s12 = smov 4  }
  0x11   :  { %35 = dma.hbm_to_vmem [thread:$0]  %s2204_s5, 2048, %s30_s25, [#allocation4], %s1749_s11, %s1749_s11, %s1750_s12  }
  0x12   :  { %1744 = dma.done.wait [#allocation4], 2048  }
  0x13   :  { %1745 = vsyncadd [#allocation4], 4294965248  ;;  %v1751_v0 = vmov 0.0   ;;  %vm1752_vm0 = vmmov 0   ;;  %v1822_v1 = vld [vmem:[%s2200_s1] sm:$0xff]   ;;  %vm81_vm1 = vcmask 130048   ;;  %v68_v4 = vlaneseq }
  0x14   :  { %1545 = vmatprep.subr.bf16.mxu0 %v1751_v0  ;;  %1547 = vmatprep.mubr.msk.bf16.mxu0 %vm1752_vm0, %v1751_v0  ;;  %v42_v2 = vld [vmem:[%s2199_s0] sm:$0xff]  ;;  %v1753_v12 = vmov 0.5   ;;  %s1754_s0 = smov 32   ;;  %v1867_v25 = vld [vmem:[%s2202_s3 + $0x14] ss:$8 sps:$4 sm:$0xff]   ;;  %v1756_v33 = vmov 0  }
  0x15   :  { %1546 = vmatpush3.bf16.msra.mxu0 %v1822_v1  ;;  %v1828_v3 = vpack.c.bf16 %v42_v2, %v42_v2  ;;  %v1839_v5 = vld [vmem:[%s2201_s2] ss:$0 sm:$0xff]  ;;  %v69_v9 = vand.u32 127, %v68_v4  ;;  %s1755_s2 = smov 112   ;;  %v1857_v23 = vld [vmem:[%s2202_s3 + $0x4] ss:$8 sps:$4 sm:$0xff]   ;;  %228 = vmatprep.mubr.bf16.mxu1 %v1756_v33 }
  0x16   :  { %1551 = vmatprep.subr.bf16.mxu0 %v1751_v0  ;;  %v1862_v24 = vld [vmem:[%s2202_s3] ss:$8 sps:$4 sm:$0xff]   ;;  %196 = vmatprep.subr.bf16.mxu1 %v1857_v23  ;;  %v1875_v26 = vld [vmem:[%s2202_s3 + $0x10] ss:$8 sps:$4 sm:$0xff]   ;;  %v1881_v27 = vld [vmem:[%s2202_s3 + $0x24] ss:$8 sps:$4 sm:$0xff]  }
  0x17   :  { %vm70_vm2 = vcmp.ge.s32.totalorder %v69_v9, 64  ;;  %vm71_vm3 = vcmp.lt.s32.totalorder %v69_v9, 96  ;;  %197 = vmatpush1.bf16.msra.mxu1 %v1862_v24  ;;  %v1887_v28 = vld [vmem:[%s2202_s3 + $0x20] ss:$8 sps:$4 sm:$0xff]   ;;  %v1893_v29 = vld [vmem:[%s2202_s3 + $0x34] ss:$8 sps:$4 sm:$0xff]  }
  0x18   :  { %1548 = vmatmul.mubr.msk.bf16.vlgmr.msra.gmra.mrb[0].mxu0 %vm81_vm1, %v1828_v3  ;;  %vm72_vm4 = vmand %vm70_vm2, %vm71_vm3  ;;  %198 = vmatprep.subr.bf16.mxu1 %v1867_v25  ;;  %v1901_v32 = vld [vmem:[%s2202_s3 + $0x30] ss:$8 sps:$4 sm:$0xff]   ;;  %vm149_vm5 = vcmask 261120   ;;  %vm192_vm6 = vcmask 523264   ;;  %v1932_v44 = vld [vmem:[%s2203_s4] ss:$0 sm:$0xff] }
  0x19   :  { %1552 = vmatpush3.bf16.msra.mxu0 %v1822_v1  ;;  %1553 = vmatprep.mubr.msk.bf16.mxu0 %vm1752_vm0, %v1751_v0  ;;  %v1842_v13 = vsel %vm72_vm4, 1.0, %v1753_v12  ;;  %v1844_v15 = vsel %vm72_vm4, 0.0, %v1753_v12  ;;  %s1757_s4 = smov 96   ;;  %s1758_s14 = smov 80   ;;  %vm474_vm7 = vcmask 523520   ;;  %vm617_vm8 = vcmask 785920  }
  0x1a   :  { %342 = vmatprep.subr.bf16.mxu0 %v1857_v23  ;;  %s1759_s15 = smov 48   ;;  %s1760_s16 = smov 16   ;;  %vm759_vm9 = vcmask 1048320  }
  0x1b   :  { %199 = vmatpush1.bf16.msra.mxu1 %v1875_v26  ;;  %s1761_s18 = smov [#allocation6]  }
  0x1c   :  { %200 = vmatprep.subr.bf16.mxu1 %v1881_v27  ;;  %s1454_s1 = sshll.u32 %s1761_s18, 4  ;;  %s1455_s1 = int_to_ptr.vmem [resolvable:$true] %s1454_s1 }
  0x1d   :  { %s1722_s5 = scalar_lea.vmem %s1455_s1, 128  ;;  %p1727_p9 = scmp.lt.s32.totalorder %s1455_s1, %s1455_s1 }
  0x1e   :  { %p1723_p8 = scmp.ne.s32.totalorder %s1455_s1, %s1722_s5  ;;  %p1728_p10 = scmp.lt.s32.totalorder %s1722_s5, %s1722_s5 }
  0x1f   :  { %201 = vmatpush1.bf16.msra.mxu1 %v1887_v28 }
  0x20   :  { %202 = vmatprep.subr.bf16.mxu1 %v1893_v29  ;;  %p1729_p11 = por %p1728_p10, %p1727_p9 }
  0x22   :  { %p1730_p12 = pnand %p1729_p11, %p1723_p8 }
  0x23   :  { %203 = vmatpush1.bf16.msra.mxu1 %v1901_v32 }
  0x24   :  { %485 = vmatprep.subr.bf16.mxu1 %v1857_v23 }
  0xeb   :  { %v119_v6 = vpop.f32.mrb[0].mxu0 }
  0xec   :  { %v120_v7 = vadd.f32 %v1839_v5, %v119_v6  ;;  %v1549_v8 = vpop.f32.mrb[1].mxu0 }
  0xed   :  { %v122_v10 = vpop.f32.mrb[2].mxu0 }
  0xee   :  { %1636 = vtanh.f32 %v120_v7  ;;  %v1550_v11 = vpop.f32.mrb[3].mxu0 }
  0xf8   :  { %v1637_v14 = vpop.eup %1636 }
  0xf9   :  { %v126_v16 = vmul.f32 %v1637_v14, %v1842_v13 }
  0xfb   :  { %v127_v17 = vadd.f32 %v126_v16, %v1844_v15 }
  0xfd   :  { %130 = vrot.lane.b32.xlu0 %v127_v17, %s1749_s11  ;;  %v128_v20 = vmul.f32 0.0, %v127_v17 }
 0x16f   :  { %v131_v18 = vpop.permute.xlu0 %130 }
 0x170   :  { %v133_v19 = vmul.f32 %v131_v18, %v127_v17 }
 0x172   :  { %135 = vrot.lane.b32.xlu0 %v133_v19, %s1754_s0 }
 0x176   :  { %238 = vrot.lane.b32.xlu0 %v1828_v3, %s1755_s2 }
 0x1e4   :  { %v136_v21 = vpop.permute.xlu0 %135 }
 0x1e5   :  { %v1850_v22 = vadd.f32 %v136_v21, %v128_v20 }
 0x1e7   :  { %1638 = vtanh.f32 %v1850_v22 }
 0x1e8   :  { %v239_v31 = vpop.permute.xlu0 %238 }
 0x1e9   :  { %1554 = vmatmul.mubr.msk.bf16.vlgmr.msra.gmra.mrb[4].mxu0 %vm81_vm1, %v239_v31 }
 0x1ea   :  { %343 = vmatpush1.bf16.msra.mxu0 %v1862_v24  ;;  %374 = vmatprep.mubr.bf16.mxu0 %v1756_v33 }
 0x1eb   :  { %344 = vmatprep.subr.bf16.mxu0 %v1867_v25 }
 0x1ee   :  { %345 = vmatpush1.bf16.msra.mxu0 %v1875_v26 }
 0x1ef   :  { %346 = vmatprep.subr.bf16.mxu0 %v1881_v27 }
 0x1f1   :  { %v1639_v30 = vpop.eup %1638 }
 0x1f2   :  { %141 = vrot.lane.b32.xlu1 %v1639_v30, %s1749_s11  ;;  %347 = vmatpush1.bf16.msra.mxu0 %v1887_v28 }
 0x1f3   :  { %348 = vmatprep.subr.bf16.mxu0 %v1893_v29 }
 0x1f6   :  { %349 = vmatpush1.bf16.msra.mxu0 %v1901_v32 }
 0x1f7   :  { %1557 = vmatprep.subr.bf16.mxu0 %v1751_v0 }
 0x264   :  { %v142_v34 = vpop.permute.xlu1 %141 }
 0x265   :  { %v144_v35 = vmul.f32 %v142_v34, %v127_v17 }
 0x267   :  { %146 = vrot.lane.b32.xlu1 %v144_v35, %s1754_s0 }
 0x2bc   :  { %v277_v39 = vpop.f32.mrb[4].mxu0 }
 0x2bd   :  { %v1555_v40 = vpop.f32.mrb[5].mxu0  ;;  %v278_v43 = vadd.f32 %v1839_v5, %v277_v39 }
 0x2be   :  { %v280_v41 = vpop.f32.mrb[6].mxu0 }
 0x2bf   :  { %v1556_v42 = vpop.f32.mrb[7].mxu0 }
 0x2d9   :  { %v147_v36 = vpop.permute.xlu1 %146 }
 0x2da   :  { %v150_v37 = vsel %vm149_vm5, %v147_v36, 0.0 }
 0x2db   :  { %v151_v38 = vpack.c.bf16 %v150_v37, %v150_v37 }
 0x2dd   :  { %1475 = vmatmul.mubr.msk.bf16.vlgmr.msra.gmra.mrb[0].mxu1 %vm192_vm6, %v151_v38 }
 0x2de   :  { %486 = vmatpush1.bf16.msra.mxu1 %v1862_v24  ;;  %517 = vmatprep.mubr.bf16.mxu1 %v1756_v33 }
 0x2df   :  { %487 = vmatprep.subr.bf16.mxu1 %v1867_v25 }
 0x2e2   :  { %488 = vmatpush1.bf16.msra.mxu1 %v1875_v26 }
 0x2e3   :  { %489 = vmatprep.subr.bf16.mxu1 %v1881_v27 }
 0x2e6   :  { %490 = vmatpush1.bf16.msra.mxu1 %v1887_v28 }
 0x2e7   :  { %491 = vmatprep.subr.bf16.mxu1 %v1893_v29 }
 0x2ea   :  { %492 = vmatpush1.bf16.msra.mxu1 %v1901_v32 }
 0x2eb   :  { %1569 = vmatprep.subr.bf16.mxu1 %v1751_v0 }
 0x3b0   :  { %v230_v45 = vpop.f32.mrb[0].mxu1 }
 0x3b1   :  { %v283_v46 = vadd.f32 %v278_v43, %v230_v45  ;;  %v232_v47 = vpop.f32.mrb[1].mxu1 }
 0x3b2   :  { %v304_v48 = vadd.f32 %v1932_v44, %v232_v47  ;;  %v234_v49 = vpop.f32.mrb[2].mxu1 }
 0x3b3   :  { %1640 = vtanh.f32 %v283_v46  ;;  %v235_v50 = vpop.f32.mrb[3].mxu1 }
 0x3b4   :  { %1642 = vtanh.f32 %v304_v48 }
 0x3bd   :  { %v1641_v51 = vpop.eup %1640 }
 0x3be   :  { %v1643_v52 = vpop.eup %1642  ;;  %v285_v53 = vmul.f32 %v1641_v51, %v1842_v13 }
 0x3bf   :  { %v306_v54 = vmul.f32 %v1643_v52, %v1842_v13 }
 0x3c0   :  { %v286_v55 = vadd.f32 %v285_v53, %v1844_v15 }
 0x3c1   :  { %v307_v56 = vadd.f32 %v306_v54, %v1844_v15 }
 0x3c2   :  { %289 = vrot.lane.b32.xlu1 %v286_v55, %s1749_s11  ;;  %v287_v61 = vmul.f32 %v286_v55, %v1850_v22 }
 0x3c3   :  { %310 = vrot.lane.b32.xlu0 %v307_v56, %s1749_s11  ;;  %v308_v63 = vmul.f32 0.0, %v307_v56 }
 0x434   :  { %v290_v57 = vpop.permute.xlu1 %289 }
 0x435   :  { %v292_v58 = vmul.f32 %v290_v57, %v286_v55  ;;  %v311_v59 = vpop.permute.xlu0 %310 }
 0x436   :  { %v313_v60 = vmul.f32 %v311_v59, %v307_v56 }
 0x437   :  { %294 = vrot.lane.b32.xlu1 %v292_v58, %s1754_s0 }
 0x438   :  { %315 = vrot.lane.b32.xlu0 %v313_v60, %s1754_s0 }
 0x4a9   :  { %v295_v62 = vpop.permute.xlu1 %294 }
 0x4aa   :  { %v297_v2 = vadd.f32 %v295_v62, %v287_v61  ;;  %v316_v4 = vpop.permute.xlu0 %315 }
 0x4ab   :  { %v318_v6 = vadd.f32 %v316_v4, %v308_v63 }
 0x4ac   :  { %1644 = vtanh.f32 %v297_v2 }
 0x4ad   :  { %1646 = vtanh.f32 %v318_v6 }
 0x4b6   :  { %v1645_v7 = vpop.eup %1644 }
 0x4b7   :  { %v1647_v8 = vpop.eup %1646  ;;  %300 = vrot.lane.b32.xlu1 %v1645_v7, %s1749_s11 }
 0x4b8   :  { %321 = vrot.lane.b32.xlu0 %v1647_v8, %s1749_s11 }
 0x529   :  { %v301_v9 = vpop.permute.xlu1 %300 }
 0x52a   :  { %v303_v10 = vmul.f32 %v301_v9, %v286_v55  ;;  %v322_v11 = vpop.permute.xlu0 %321 }
 0x52b   :  { %v1946_v12 = vmul.f32 %v322_v11, %v307_v56 }
 0x52c   :  { %331 = vrot.lane.b32.xlu1 %v303_v10, %s1754_s0 }
 0x52d   :  { %334 = vrot.lane.b32.xlu0 %v1946_v12, %s1749_s11 }
 0x530   :  { %383 = vrot.lane.b32.xlu1 %v1828_v3, %s1757_s4 }
 0x59e   :  { %v332_v14 = vpop.permute.xlu1 %331 }
 0x59f   :  { %v335_v16 = vpop.permute.xlu0 %334 }
 0x5a0   :  { %v337_v17 = vsel %vm149_vm5, %v332_v14, %v335_v16 }
 0x5a1   :  { %v338_v18 = vpack.c.bf16 %v337_v17, %v337_v17 }
 0x5a2   :  { %v384_v19 = vpop.permute.xlu1 %383 }
 0x5a3   :  { %1477 = vmatmul.mubr.msk.bf16.vlgmr.msra.gmra.mrb[8].mxu0 %vm192_vm6, %v338_v18 }
 0x5a4   :  { %1558 = vmatpush3.bf16.msra.mxu0 %v1822_v1  ;;  %1559 = vmatprep.mubr.msk.bf16.mxu0 %vm1752_vm0, %v1751_v0 }
 0x5a5   :  { %1563 = vmatprep.subr.bf16.mxu0 %v1751_v0 }
 0x5ab   :  { %1560 = vmatmul.mubr.msk.bf16.vlgmr.msra.gmra.mrb[12].mxu0 %vm81_vm1, %v384_v19 }
 0x5ac   :  { %1564 = vmatpush3.bf16.msra.mxu0 %v1822_v1  ;;  %1565 = vmatprep.mubr.msk.bf16.mxu0 %vm1752_vm0, %v1751_v0 }
 0x5ad   :  { %631 = vmatprep.subr.bf16.mxu0 %v1857_v23 }
 0x676   :  { %v376_v20 = vpop.f32.mrb[8].mxu0 }
 0x677   :  { %v378_v21 = vpop.f32.mrb[9].mxu0 }
 0x678   :  { %v449_v22 = vadd.f32 %v1932_v44, %v378_v21  ;;  %v380_v30 = vpop.f32.mrb[10].mxu0 }
 0x679   :  { %v381_v31 = vpop.f32.mrb[11].mxu0 }
 0x67a   :  { %1648 = vtanh.f32 %v449_v22 }
 0x67e   :  { %v422_v34 = vpop.f32.mrb[12].mxu0 }
 0x67f   :  { %v423_v35 = vadd.f32 %v1839_v5, %v422_v34  ;;  %v1561_v36 = vpop.f32.mrb[13].mxu0 }
 0x680   :  { %v425_v37 = vpop.f32.mrb[14].mxu0 }
 0x681   :  { %v428_v38 = vadd.f32 %v423_v35, %v376_v20  ;;  %v1562_v39 = vpop.f32.mrb[15].mxu0 }
 0x683   :  { %1650 = vtanh.f32 %v428_v38 }
 0x684   :  { %v1649_v40 = vpop.eup %1648 }
 0x685   :  { %v451_v41 = vmul.f32 %v1649_v40, %v1842_v13 }
 0x687   :  { %v452_v42 = vadd.f32 %v451_v41, %v1844_v15 }
 0x689   :  { %455 = vrot.lane.b32.xlu1 %v452_v42, %s1749_s11  ;;  %v453_v51 = vmul.f32 %v452_v42, %v318_v6 }
 0x68d   :  { %v1651_v43 = vpop.eup %1650 }
 0x68e   :  { %v430_v45 = vmul.f32 %v1651_v43, %v1842_v13 }
 0x690   :  { %v431_v46 = vadd.f32 %v430_v45, %v1844_v15 }
 0x692   :  { %434 = vrot.lane.b32.xlu0 %v431_v46, %s1749_s11  ;;  %v432_v54 = vmul.f32 %v431_v46, %v297_v2 }
 0x6fb   :  { %v456_v47 = vpop.permute.xlu1 %455 }
 0x6fc   :  { %v458_v48 = vmul.f32 %v456_v47, %v452_v42 }
 0x6fe   :  { %460 = vrot.lane.b32.xlu1 %v458_v48, %s1754_s0 }
 0x704   :  { %v435_v49 = vpop.permute.xlu0 %434 }
 0x705   :  { %v437_v50 = vmul.f32 %v435_v49, %v431_v46 }
 0x707   :  { %439 = vrot.lane.b32.xlu0 %v437_v50, %s1754_s0 }
 0x770   :  { %v461_v52 = vpop.permute.xlu1 %460 }
 0x771   :  { %v1974_v53 = vadd.f32 %v461_v52, %v453_v51 }
 0x773   :  { %1652 = vtanh.f32 %v1974_v53 }
 0x779   :  { %v440_v55 = vpop.permute.xlu0 %439 }
 0x77a   :  { %v442_v56 = vadd.f32 %v440_v55, %v432_v54 }
 0x77c   :  { %1654 = vtanh.f32 %v442_v56 }
 0x77d   :  { %v1653_v57 = vpop.eup %1652 }
 0x77e   :  { %466 = vrot.lane.b32.xlu1 %v1653_v57, %s1749_s11 }
 0x786   :  { %v1655_v58 = vpop.eup %1654 }
 0x787   :  { %445 = vrot.lane.b32.xlu0 %v1655_v58, %s1749_s11 }
 0x7f0   :  { %v467_v59 = vpop.permute.xlu1 %466 }
 0x7f1   :  { %v469_v60 = vmul.f32 %v467_v59, %v452_v42 }
 0x7f3   :  { %471 = vrot.lane.b32.xlu0 %v469_v60, %s1749_s11 }
 0x7f7   :  { %526 = vrot.lane.b32.xlu0 %v1828_v3, %s1758_s14 }
 0x7f9   :  { %v446_v61 = vpop.permute.xlu0 %445 }
 0x7fa   :  { %v448_v62 = vmul.f32 %v446_v61, %v431_v46 }
 0x7fc   :  { %477 = vrot.lane.b32.xlu1 %v448_v62, %s1754_s0 }
 0x865   :  { %v1982_v63 = vpop.permute.xlu0 %471 }
 0x869   :  { %v527_v2 = vpop.permute.xlu0 %526 }
 0x86a   :  { %1566 = vmatmul.mubr.msk.bf16.vlgmr.msra.gmra.mrb[16].mxu0 %vm81_vm1, %v527_v2 }
 0x86b   :  { %632 = vmatpush1.bf16.msra.mxu0 %v1862_v24  ;;  %663 = vmatprep.mubr.bf16.mxu0 %v1756_v33 }
 0x86c   :  { %633 = vmatprep.subr.bf16.mxu0 %v1867_v25 }
 0x86e   :  { %v478_v4 = vpop.permute.xlu1 %477 }
 0x86f   :  { %v480_v6 = vsel %vm149_vm5, %v478_v4, %v1982_v63  ;;  %634 = vmatpush1.bf16.msra.mxu0 %v1875_v26 }
 0x870   :  { %v481_v7 = vpack.c.bf16 %v480_v6, %v480_v6  ;;  %635 = vmatprep.subr.bf16.mxu0 %v1881_v27 }
 0x872   :  { %1479 = vmatmul.mubr.msk.bf16.vlgmr.msra.gmra.mrb[4].mxu1 %vm192_vm6, %v481_v7 }
 0x873   :  { %1570 = vmatpush3.bf16.msra.mxu1 %v1822_v1  ;;  %636 = vmatpush1.bf16.msra.mxu0 %v1887_v28 }
 0x874   :  { %637 = vmatprep.subr.bf16.mxu0 %v1893_v29  ;;  %1571 = vmatprep.mubr.msk.bf16.mxu1 %vm1752_vm0, %v1751_v0 }
 0x875   :  { %774 = vmatprep.subr.bf16.mxu1 %v1857_v23 }
 0x877   :  { %638 = vmatpush1.bf16.msra.mxu0 %v1901_v32 }
 0x878   :  { %1575 = vmatprep.subr.bf16.mxu0 %v1751_v0 }
 0x93d   :  { %v565_v8 = vpop.f32.mrb[16].mxu0 }
 0x93e   :  { %v1567_v9 = vpop.f32.mrb[17].mxu0  ;;  %v566_v14 = vadd.f32 %v1839_v5, %v565_v8 }
 0x93f   :  { %v568_v10 = vpop.f32.mrb[18].mxu0 }
 0x940   :  { %v1568_v11 = vpop.f32.mrb[19].mxu0 }
 0x945   :  { %v519_v16 = vpop.f32.mrb[4].mxu1 }
 0x946   :  { %v571_v17 = vadd.f32 %v566_v14, %v519_v16  ;;  %v521_v18 = vpop.f32.mrb[5].mxu1 }
 0x947   :  { %v592_v19 = vadd.f32 %v1932_v44, %v521_v18  ;;  %v523_v20 = vpop.f32.mrb[6].mxu1 }
 0x948   :  { %1656 = vtanh.f32 %v571_v17  ;;  %v524_v21 = vpop.f32.mrb[7].mxu1 }
 0x949   :  { %1658 = vtanh.f32 %v592_v19 }
 0x952   :  { %v1657_v22 = vpop.eup %1656 }
 0x953   :  { %v1659_v30 = vpop.eup %1658  ;;  %v573_v31 = vmul.f32 %v1657_v22, %v1842_v13 }
 0x954   :  { %v594_v34 = vmul.f32 %v1659_v30, %v1842_v13 }
 0x955   :  { %v574_v35 = vadd.f32 %v573_v31, %v1844_v15 }
 0x956   :  { %v595_v36 = vadd.f32 %v594_v34, %v1844_v15 }
 0x957   :  { %577 = vrot.lane.b32.xlu1 %v574_v35, %s1749_s11  ;;  %v575_v41 = vmul.f32 %v574_v35, %v442_v56 }
 0x958   :  { %598 = vrot.lane.b32.xlu0 %v595_v36, %s1749_s11  ;;  %v596_v43 = vmul.f32 %v595_v36, %v1974_v53 }
 0x9c9   :  { %v578_v37 = vpop.permute.xlu1 %577 }
 0x9ca   :  { %v580_v38 = vmul.f32 %v578_v37, %v574_v35  ;;  %v599_v39 = vpop.permute.xlu0 %598 }
 0x9cb   :  { %v601_v40 = vmul.f32 %v599_v39, %v595_v36 }
 0x9cc   :  { %582 = vrot.lane.b32.xlu1 %v580_v38, %s1754_s0 }
 0x9cd   :  { %603 = vrot.lane.b32.xlu0 %v601_v40, %s1754_s0 }
 0xa3e   :  { %v583_v42 = vpop.permute.xlu1 %582 }
 0xa3f   :  { %v2012_v45 = vadd.f32 %v583_v42, %v575_v41  ;;  %v604_v46 = vpop.permute.xlu0 %603 }
 0xa40   :  { %v606_v47 = vadd.f32 %v604_v46, %v596_v43 }
 0xa41   :  { %1660 = vtanh.f32 %v2012_v45 }
 0xa42   :  { %1662 = vtanh.f32 %v606_v47 }
 0xa4b   :  { %v1661_v48 = vpop.eup %1660 }
 0xa4c   :  { %v1663_v49 = vpop.eup %1662  ;;  %588 = vrot.lane.b32.xlu1 %v1661_v48, %s1749_s11 }
 0xa4d   :  { %609 = vrot.lane.b32.xlu0 %v1663_v49, %s1749_s11 }
 0xabe   :  { %v589_v50 = vpop.permute.xlu1 %588 }
 0xabf   :  { %v591_v51 = vmul.f32 %v589_v50, %v574_v35  ;;  %v610_v52 = vpop.permute.xlu0 %609 }
 0xac0   :  { %v2017_v54 = vmul.f32 %v610_v52, %v595_v36 }
 0xac1   :  { %620 = vrot.lane.b32.xlu1 %v591_v51, %s1754_s0 }
 0xac2   :  { %623 = vrot.lane.b32.xlu0 %v2017_v54, %s1749_s11 }
 0xac5   :  { %672 = vrot.lane.b32.xlu1 %v1828_v3, %s1749_s11 }
 0xb33   :  { %v621_v53 = vpop.permute.xlu1 %620 }
 0xb34   :  { %v624_v55 = vpop.permute.xlu0 %623 }
 0xb35   :  { %v626_v56 = vsel %vm149_vm5, %v621_v53, %v624_v55 }
 0xb36   :  { %v627_v57 = vpack.c.bf16 %v626_v56, %v626_v56 }
 0xb37   :  { %v673_v58 = vpop.permute.xlu1 %672 }
 0xb38   :  { %1481 = vmatmul.mubr.msk.bf16.vlgmr.msra.gmra.mrb[20].mxu0 %vm192_vm6, %v627_v57  ;;  %1572 = vmatmul.mubr.msk.bf16.vlgmr.msra.gmra.mrb[8].mxu1 %vm81_vm1, %v673_v58 }
 0xb39   :  { %775 = vmatpush1.bf16.msra.mxu1 %v1862_v24  ;;  %1576 = vmatpush3.bf16.msra.mxu0 %v1822_v1 }
 0xb3a   :  { %776 = vmatprep.subr.bf16.mxu1 %v1867_v25  ;;  %806 = vmatprep.mubr.bf16.mxu1 %v1756_v33 }
 0xb3b   :  { %1577 = vmatprep.mubr.msk.bf16.mxu0 %vm1752_vm0, %v1751_v0  ;;  %919 = vmatprep.subr.bf16.mxu0 %v1857_v23 }
 0xb3d   :  { %777 = vmatpush1.bf16.msra.mxu1 %v1875_v26 }
 0xb3e   :  { %778 = vmatprep.subr.bf16.mxu1 %v1881_v27 }
 0xb41   :  { %779 = vmatpush1.bf16.msra.mxu1 %v1887_v28 }
 0xb42   :  { %780 = vmatprep.subr.bf16.mxu1 %v1893_v29 }
 0xb45   :  { %781 = vmatpush1.bf16.msra.mxu1 %v1901_v32 }
 0xb46   :  { %1581 = vmatprep.subr.bf16.mxu1 %v1751_v0 }
 0xc0b   :  { %v665_v59 = vpop.f32.mrb[20].mxu0  ;;  %v711_v60 = vpop.f32.mrb[8].mxu1 }
 0xc0c   :  { %v712_v61 = vadd.f32 %v1839_v5, %v711_v60  ;;  %v667_v62 = vpop.f32.mrb[21].mxu0  ;;  %v1573_v2 = vpop.f32.mrb[9].mxu1 }
 0xc0d   :  { %v738_v4 = vadd.f32 %v1932_v44, %v667_v62  ;;  %v669_v6 = vpop.f32.mrb[22].mxu0  ;;  %v714_v7 = vpop.f32.mrb[10].mxu1 }
 0xc0e   :  { %v717_v8 = vadd.f32 %v712_v61, %v665_v59  ;;  %v670_v9 = vpop.f32.mrb[23].mxu0  ;;  %v1574_v10 = vpop.f32.mrb[11].mxu1 }
 0xc0f   :  { %1664 = vtanh.f32 %v738_v4 }
 0xc10   :  { %1666 = vtanh.f32 %v717_v8 }
 0xc19   :  { %v1665_v11 = vpop.eup %1664 }
 0xc1a   :  { %v1667_v14 = vpop.eup %1666  ;;  %v740_v16 = vmul.f32 %v1665_v11, %v1842_v13 }
 0xc1b   :  { %v719_v17 = vmul.f32 %v1667_v14, %v1842_v13 }
 0xc1c   :  { %v741_v18 = vadd.f32 %v740_v16, %v1844_v15 }
 0xc1d   :  { %v720_v19 = vadd.f32 %v719_v17, %v1844_v15 }
 0xc1e   :  { %744 = vrot.lane.b32.xlu1 %v741_v18, %s1749_s11  ;;  %v742_v31 = vmul.f32 %v741_v18, %v606_v47 }
 0xc1f   :  { %723 = vrot.lane.b32.xlu0 %v720_v19, %s1749_s11  ;;  %v721_v35 = vmul.f32 %v720_v19, %v2012_v45 }
 0xc90   :  { %v745_v20 = vpop.permute.xlu1 %744 }
 0xc91   :  { %v747_v21 = vmul.f32 %v745_v20, %v741_v18  ;;  %v724_v22 = vpop.permute.xlu0 %723 }
 0xc92   :  { %v726_v30 = vmul.f32 %v724_v22, %v720_v19 }
 0xc93   :  { %749 = vrot.lane.b32.xlu1 %v747_v21, %s1754_s0 }
 0xc94   :  { %728 = vrot.lane.b32.xlu0 %v726_v30, %s1754_s0 }
 0xd05   :  { %v750_v34 = vpop.permute.xlu1 %749 }
 0xd06   :  { %v2051_v36 = vadd.f32 %v750_v34, %v742_v31  ;;  %v729_v37 = vpop.permute.xlu0 %728 }
 0xd07   :  { %v2053_v38 = vadd.f32 %v729_v37, %v721_v35 }
 0xd08   :  { %1668 = vtanh.f32 %v2051_v36 }
 0xd09   :  { %1670 = vtanh.f32 %v2053_v38 }
 0xd12   :  { %v1669_v39 = vpop.eup %1668 }
 0xd13   :  { %v1671_v40 = vpop.eup %1670  ;;  %755 = vrot.lane.b32.xlu1 %v1669_v39, %s1749_s11 }
 0xd14   :  { %734 = vrot.lane.b32.xlu0 %v1671_v40, %s1749_s11 }
 0xd85   :  { %v756_v41 = vpop.permute.xlu1 %755 }
 0xd86   :  { %v2059_v42 = vmul.f32 %v756_v41, %v741_v18  ;;  %v735_v43 = vpop.permute.xlu0 %734 }
 0xd87   :  { %v737_v45 = vmul.f32 %v735_v43, %v720_v19 }
 0xd88   :  { %766 = vrot.lane.b32.xlu1 %v2059_v42, %s1749_s11 }
 0xd89   :  { %762 = vrot.lane.b32.xlu0 %v737_v45, %s1754_s0 }
 0xd8d   :  { %815 = vrot.lane.b32.xlu0 %v1828_v3, %s1759_s15 }
 0xdfa   :  { %v767_v46 = vpop.permute.xlu1 %766 }
 0xdfb   :  { %v763_v47 = vpop.permute.xlu0 %762 }
 0xdfc   :  { %v769_v48 = vsel %vm149_vm5, %v763_v47, %v767_v46 }
 0xdfd   :  { %v770_v49 = vpack.c.bf16 %v769_v48, %v769_v48 }
 0xdff   :  { %v816_v50 = vpop.permute.xlu0 %815  ;;  %1483 = vmatmul.mubr.msk.bf16.vlgmr.msra.gmra.mrb[12].mxu1 %vm192_vm6, %v770_v49 }
 0xe00   :  { %1578 = vmatmul.mubr.msk.bf16.vlgmr.msra.gmra.mrb[24].mxu0 %vm81_vm1, %v816_v50  ;;  %1582 = vmatpush3.bf16.msra.mxu1 %v1822_v1 }
 0xe01   :  { %920 = vmatpush1.bf16.msra.mxu0 %v1862_v24  ;;  %951 = vmatprep.mubr.bf16.mxu0 %v1756_v33 }
 0xe02   :  { %921 = vmatprep.subr.bf16.mxu0 %v1867_v25  ;;  %1583 = vmatprep.mubr.msk.bf16.mxu1 %vm1752_vm0, %v1751_v0 }
 0xe03   :  { %1061 = vmatprep.subr.bf16.mxu1 %v1857_v23 }
 0xe05   :  { %922 = vmatpush1.bf16.msra.mxu0 %v1875_v26 }
 0xe06   :  { %923 = vmatprep.subr.bf16.mxu0 %v1881_v27 }
 0xe09   :  { %924 = vmatpush1.bf16.msra.mxu0 %v1887_v28 }
 0xe0a   :  { %925 = vmatprep.subr.bf16.mxu0 %v1893_v29 }
 0xe0d   :  { %926 = vmatpush1.bf16.msra.mxu0 %v1901_v32 }
 0xe0e   :  { %1587 = vmatprep.subr.bf16.mxu0 %v1751_v0 }
 0xed2   :  { %v808_v51 = vpop.f32.mrb[12].mxu1 }
 0xed3   :  { %v810_v52 = vpop.f32.mrb[13].mxu1  ;;  %v854_v53 = vpop.f32.mrb[24].mxu0 }
 0xed4   :  { %v881_v55 = vadd.f32 %v1932_v44, %v810_v52  ;;  %v855_v56 = vadd.f32 %v1839_v5, %v854_v53  ;;  %v812_v57 = vpop.f32.mrb[14].mxu1  ;;  %v1579_v58 = vpop.f32.mrb[25].mxu0 }
 0xed5   :  { %v813_v59 = vpop.f32.mrb[15].mxu1  ;;  %v857_v60 = vpop.f32.mrb[26].mxu0 }
 0xed6   :  { %1672 = vtanh.f32 %v881_v55  ;;  %v860_v61 = vadd.f32 %v855_v56, %v808_v51  ;;  %v1580_v62 = vpop.f32.mrb[27].mxu0 }
 0xed8   :  { %1674 = vtanh.f32 %v860_v61 }
 0xee0   :  { %v1673_v2 = vpop.eup %1672 }
 0xee1   :  { %v883_v4 = vmul.f32 %v1673_v2, %v1842_v13 }
 0xee2   :  { %v1675_v6 = vpop.eup %1674 }
 0xee3   :  { %v884_v7 = vadd.f32 %v883_v4, %v1844_v15  ;;  %v862_v8 = vmul.f32 %v1675_v6, %v1842_v13 }
 0xee5   :  { %887 = vrot.lane.b32.xlu0 %v884_v7, %s1749_s11  ;;  %v863_v9 = vadd.f32 %v862_v8, %v1844_v15  ;;  %v885_v17 = vmul.f32 %v884_v7, %v2051_v36 }
 0xee7   :  { %866 = vrot.lane.b32.xlu1 %v863_v9, %s1749_s11  ;;  %v864_v20 = vmul.f32 %v863_v9, %v2053_v38 }
 0xf57   :  { %v888_v10 = vpop.permute.xlu0 %887 }
 0xf58   :  { %v890_v11 = vmul.f32 %v888_v10, %v884_v7 }
 0xf59   :  { %v867_v14 = vpop.permute.xlu1 %866 }
 0xf5a   :  { %v869_v16 = vmul.f32 %v867_v14, %v863_v9  ;;  %892 = vrot.lane.b32.xlu0 %v890_v11, %s1754_s0 }
 0xf5c   :  { %871 = vrot.lane.b32.xlu1 %v869_v16, %s1754_s0 }
 0xfcc   :  { %v893_v18 = vpop.permute.xlu0 %892 }
 0xfcd   :  { %v895_v19 = vadd.f32 %v893_v18, %v885_v17 }
 0xfce   :  { %v872_v21 = vpop.permute.xlu1 %871 }
 0xfcf   :  { %1676 = vtanh.f32 %v895_v19  ;;  %v874_v22 = vadd.f32 %v872_v21, %v864_v20 }
 0xfd1   :  { %1678 = vtanh.f32 %v874_v22 }
 0xfd9   :  { %v1677_v30 = vpop.eup %1676 }
 0xfda   :  { %898 = vrot.lane.b32.xlu0 %v1677_v30, %s1749_s11 }
 0xfdb   :  { %v1679_v31 = vpop.eup %1678 }
 0xfdc   :  { %877 = vrot.lane.b32.xlu1 %v1679_v31, %s1749_s11 }
0x104c   :  { %v899_v34 = vpop.permute.xlu0 %898 }
0x104d   :  { %v2095_v35 = vmul.f32 %v899_v34, %v884_v7 }
0x104e   :  { %v878_v37 = vpop.permute.xlu1 %877 }
0x104f   :  { %v880_v39 = vmul.f32 %v878_v37, %v863_v9  ;;  %911 = vrot.lane.b32.xlu0 %v2095_v35, %s1749_s11 }
0x1051   :  { %908 = vrot.lane.b32.xlu1 %v880_v39, %s1754_s0 }
0x1055   :  { %960 = vrot.lane.b32.xlu1 %v1828_v3, %s1754_s0 }
0x10c1   :  { %v912_v36 = vpop.permute.xlu0 %911 }
0x10c3   :  { %v909_v38 = vpop.permute.xlu1 %908 }
0x10c4   :  { %v914_v40 = vsel %vm149_vm5, %v909_v38, %v912_v36 }
0x10c5   :  { %v915_v41 = vpack.c.bf16 %v914_v40, %v914_v40 }
0x10c7   :  { %1485 = vmatmul.mubr.msk.bf16.vlgmr.msra.gmra.mrb[28].mxu0 %vm192_vm6, %v915_v41  ;;  %v961_v43 = vpop.permute.xlu1 %960 }
0x10c8   :  { %1584 = vmatmul.mubr.msk.bf16.vlgmr.msra.gmra.mrb[16].mxu1 %vm81_vm1, %v961_v43  ;;  %1588 = vmatpush3.bf16.msra.mxu0 %v1822_v1 }
0x10c9   :  { %1062 = vmatpush1.bf16.msra.mxu1 %v1862_v24  ;;  %1589 = vmatprep.mubr.msk.bf16.mxu0 %vm1752_vm0, %v1751_v0 }
0x10ca   :  { %1063 = vmatprep.subr.bf16.mxu1 %v1867_v25  ;;  %1093 = vmatprep.mubr.bf16.mxu1 %v1756_v33 }
0x10cb   :  { %1206 = vmatprep.subr.bf16.mxu0 %v1857_v23 }
0x10cd   :  { %1064 = vmatpush1.bf16.msra.mxu1 %v1875_v26 }
0x10ce   :  { %1065 = vmatprep.subr.bf16.mxu1 %v1881_v27 }
0x10d1   :  { %1066 = vmatpush1.bf16.msra.mxu1 %v1887_v28 }
0x10d2   :  { %1067 = vmatprep.subr.bf16.mxu1 %v1893_v29 }
0x10d5   :  { %1068 = vmatpush1.bf16.msra.mxu1 %v1901_v32 }
0x119a   :  { %v953_v1 = vpop.f32.mrb[28].mxu0 }
0x119b   :  { %v955_v45 = vpop.f32.mrb[29].mxu0  ;;  %v999_v46 = vpop.f32.mrb[16].mxu1 }
0x119c   :  { %v1026_v0 = vadd.f32 %v1932_v44, %v955_v45  ;;  %v1000_v47 = vadd.f32 %v1839_v5, %v999_v46  ;;  %v957_v48 = vpop.f32.mrb[30].mxu0  ;;  %v1585_v49 = vpop.f32.mrb[17].mxu1 }
0x119d   :  { %v958_v23 = vpop.f32.mrb[31].mxu0  ;;  %v1002_v50 = vpop.f32.mrb[18].mxu1 }
0x119e   :  { %1680 = vtanh.f32 %v1026_v0  ;;  %v1005_v51 = vadd.f32 %v1000_v47, %v953_v1  ;;  %v1586_v52 = vpop.f32.mrb[19].mxu1 }
0x11a0   :  { %1682 = vtanh.f32 %v1005_v51 }
0x11a8   :  { %v1681_v53 = vpop.eup %1680 }
0x11a9   :  { %v1028_v55 = vmul.f32 %v1681_v53, %v1842_v13 }
0x11aa   :  { %v1683_v56 = vpop.eup %1682 }
0x11ab   :  { %v1029_v57 = vadd.f32 %v1028_v55, %v1844_v15  ;;  %v1007_v58 = vmul.f32 %v1683_v56, %v1842_v13 }
0x11ad   :  { %1032 = vrot.lane.b32.xlu1 %v1029_v57, %s1749_s11  ;;  %v1008_v59 = vadd.f32 %v1007_v58, %v1844_v15  ;;  %v1030_v4 = vmul.f32 %v1029_v57, %v895_v19 }
0x11af   :  { %1011 = vrot.lane.b32.xlu0 %v1008_v59, %s1749_s11  ;;  %v1009_v8 = vmul.f32 %v1008_v59, %v874_v22 }
0x121f   :  { %v1033_v60 = vpop.permute.xlu1 %1032 }
0x1220   :  { %v1035_v61 = vmul.f32 %v1033_v60, %v1029_v57 }
0x1221   :  { %v1012_v62 = vpop.permute.xlu0 %1011 }
0x1222   :  { %v1014_v2 = vmul.f32 %v1012_v62, %v1008_v59  ;;  %1037 = vrot.lane.b32.xlu1 %v1035_v61, %s1754_s0 }
0x1224   :  { %1016 = vrot.lane.b32.xlu0 %v1014_v2, %s1754_s0 }
0x1294   :  { %v1038_v6 = vpop.permute.xlu1 %1037 }
0x1295   :  { %v1040_v7 = vadd.f32 %v1038_v6, %v1030_v4 }
0x1296   :  { %v1017_v9 = vpop.permute.xlu0 %1016 }
0x1297   :  { %1684 = vtanh.f32 %v1040_v7  ;;  %v1019_v10 = vadd.f32 %v1017_v9, %v1009_v8 }
0x1299   :  { %1686 = vtanh.f32 %v1019_v10 }
0x12a1   :  { %v1685_v11 = vpop.eup %1684 }
0x12a2   :  { %1043 = vrot.lane.b32.xlu1 %v1685_v11, %s1749_s11 }
0x12a3   :  { %v1687_v14 = vpop.eup %1686 }
0x12a4   :  { %1022 = vrot.lane.b32.xlu0 %v1687_v14, %s1749_s11 }
0x1314   :  { %v1044_v16 = vpop.permute.xlu1 %1043 }
0x1315   :  { %v1046_v17 = vmul.f32 %v1044_v16, %v1029_v57 }
0x1316   :  { %v1023_v18 = vpop.permute.xlu0 %1022 }
0x1317   :  { %v1025_v20 = vmul.f32 %v1023_v18, %v1008_v59  ;;  %1048 = vrot.lane.b32.xlu0 %v1046_v17, %s1749_s11  ;;  %v1624_v17 = vld [vmem:[#allocation3 + $0x50] sm:$0xff]  }
0x1318   :  { %v1625_v18 = vld [vmem:[#allocation3 + $0x10] sm:$0xff]  }
0x1319   :  { %1053 = vrot.lane.b32.xlu1 %v1025_v20, %s1754_s0  ;;  %v1626_v20 = vld [vmem:[#allocation3 + $0x58] sm:$0xff]  }
0x131b   :  { %1102 = vrot.lane.b32.xlu0 %v1828_v3, %s1760_s16 }
0x1389   :  { %v2132_v19 = vpop.permute.xlu0 %1048 }
0x138b   :  { %v1054_v21 = vpop.permute.xlu1 %1053 }
0x138c   :  { %v1056_v22 = vsel %vm149_vm5, %v1054_v21, %v2132_v19  ;;  %v1627_v21 = vld [vmem:[#allocation3 + $0x18] sm:$0xff]  }
0x138d   :  { %v1057_v30 = vpack.c.bf16 %v1056_v22, %v1056_v22  ;;  %v1103_v31 = vpop.permute.xlu0 %1102  ;;  %v1629_v22 = vld [vmem:[#allocation3 + $0x20] sm:$0xff]  }
0x138e   :  { %1590 = vmatmul.mubr.msk.bf16.vlgmr.msra.gmra.mrb[32].mxu0 %vm81_vm1, %v1103_v31 }
0x138f   :  { %1487 = vmatmul.mubr.msk.bf16.vlgmr.msra.gmra.mrb[20].mxu1 %vm192_vm6, %v1057_v30  ;;  %1207 = vmatpush1.bf16.msra.mxu0 %v1862_v24 }
0x1390   :  { %1208 = vmatprep.subr.bf16.mxu0 %v1867_v25  ;;  %1238 = vmatprep.mubr.bf16.mxu0 %v1756_v33 }
0x1393   :  { %1209 = vmatpush1.bf16.msra.mxu0 %v1875_v26 }
0x1394   :  { %1210 = vmatprep.subr.bf16.mxu0 %v1881_v27 }
0x1397   :  { %1211 = vmatpush1.bf16.msra.mxu0 %v1887_v28 }
0x1398   :  { %1212 = vmatprep.subr.bf16.mxu0 %v1893_v29 }
0x139b   :  { %1213 = vmatpush1.bf16.msra.mxu0 %v1901_v32 }
0x1461   :  { %v1141_v3 = vpop.f32.mrb[32].mxu0 }
0x1462   :  { %v1142_v34 = vadd.f32 %v1839_v5, %v1141_v3  ;;  %v1095_v37 = vpop.f32.mrb[20].mxu1  ;;  %v1591_v39 = vpop.f32.mrb[33].mxu0  ;;  %v1630_v3 = vld [vmem:[#allocation3 + $0x68] sm:$0xff]  }
0x1463   :  { %v1097_v24 = vpop.f32.mrb[21].mxu1  ;;  %v1144_v36 = vpop.f32.mrb[34].mxu0  ;;  %v1632_v39 = vld [vmem:[#allocation3 + $0x70] sm:$0xff]  }
0x1464   :  { %v1147_v25 = vadd.f32 %v1142_v34, %v1095_v37  ;;  %v1168_v33 = vadd.f32 %v1932_v44, %v1097_v24  ;;  %v1099_v38 = vpop.f32.mrb[22].mxu1  ;;  %v1592_v26 = vpop.f32.mrb[35].mxu0  ;;  %v1631_v34 = vld [vmem:[#allocation3 + $0x28] sm:$0xff]   ;;  %v1633_v24 = vld [vmem:[#allocation3 + $0x30] sm:$0xff]   ;;  %v1634_v36 = vld [vmem:[#allocation3 + $0x78] sm:$0xff]  }
0x1465   :  { %v1100_v40 = vpop.f32.mrb[23].mxu1 }
0x1466   :  { %1688 = vtanh.f32 %v1147_v25 }
0x1467   :  { %1690 = vtanh.f32 %v1168_v33  ;;  %v1635_v33 = vld [vmem:[#allocation3 + $0x38] sm:$0xff]  }
0x1470   :  { %v1689_v27 = vpop.eup %1688 }
0x1471   :  { %v1691_v28 = vpop.eup %1690  ;;  %v1149_v29 = vmul.f32 %v1689_v27, %v1842_v13 }
0x1472   :  { %v1170_v32 = vmul.f32 %v1691_v28, %v1842_v13 }
0x1473   :  { %v1150_v5 = vadd.f32 %v1149_v29, %v1844_v15 }
0x1474   :  { %v1171_v41 = vadd.f32 %v1170_v32, %v1844_v15 }
0x1475   :  { %1153 = vrot.lane.b32.xlu1 %v1150_v5, %s1749_s11  ;;  %v1151_v0 = vmul.f32 %v1150_v5, %v1019_v10 }
0x1476   :  { %1174 = vrot.lane.b32.xlu0 %v1171_v41, %s1749_s11  ;;  %v1172_v47 = vmul.f32 %v1171_v41, %v1040_v7 }
0x14e7   :  { %v1154_v43 = vpop.permute.xlu1 %1153 }
0x14e8   :  { %v1175_v1 = vpop.permute.xlu0 %1174  ;;  %v1156_v45 = vmul.f32 %v1154_v43, %v1150_v5 }
0x14e9   :  { %v1177_v46 = vmul.f32 %v1175_v1, %v1171_v41 }
0x14ea   :  { %1158 = vrot.lane.b32.xlu1 %v1156_v45, %s1754_s0 }
0x14eb   :  { %1179 = vrot.lane.b32.xlu0 %v1177_v46, %s1754_s0 }
0x155c   :  { %v1159_v48 = vpop.permute.xlu1 %1158 }
0x155d   :  { %v1180_v49 = vpop.permute.xlu0 %1179  ;;  %v1161_v23 = vadd.f32 %v1159_v48, %v1151_v0 }
0x155e   :  { %v1182_v50 = vadd.f32 %v1180_v49, %v1172_v47 }
0x155f   :  { %1692 = vtanh.f32 %v1161_v23 }
0x1560   :  { %1694 = vtanh.f32 %v1182_v50 }
0x1569   :  { %v1693_v51 = vpop.eup %1692 }
0x156a   :  { %v1695_v52 = vpop.eup %1694  ;;  %1164 = vrot.lane.b32.xlu1 %v1693_v51, %s1749_s11 }
0x156b   :  { %1185 = vrot.lane.b32.xlu0 %v1695_v52, %s1749_s11 }
0x15dc   :  { %v1165_v53 = vpop.permute.xlu1 %1164 }
0x15dd   :  { %v1186_v55 = vpop.permute.xlu0 %1185  ;;  %v1167_v56 = vmul.f32 %v1165_v53, %v1150_v5 }
0x15de   :  { %v1188_v57 = vmul.f32 %v1186_v55, %v1171_v41 }
0x15df   :  { %1195 = vrot.lane.b32.xlu1 %v1167_v56, %s1754_s0 }
0x15e0   :  { %1198 = vrot.lane.b32.xlu0 %v1188_v57, %s1749_s11 }
0x1651   :  { %v1196_v58 = vpop.permute.xlu1 %1195 }
0x1652   :  { %v1199_v59 = vpop.permute.xlu0 %1198 }
0x1653   :  { %v1201_v60 = vsel %vm149_vm5, %v1196_v58, %v1199_v59 }
0x1654   :  { %v1202_v61 = vpack.c.bf16 %v1201_v60, %v1201_v60 }
0x1656   :  { %1489 = vmatmul.mubr.msk.bf16.vlgmr.msra.gmra.mrb[36].mxu0 %vm192_vm6, %v1202_v61 }
0x1729   :  { %v1240_v62 = vpop.f32.mrb[36].mxu0 }
0x172a   :  { %v1241_v2 = vpop.f32.mrb[37].mxu0 }
0x172b   :  { %v1246_v4 = vadd.f32 %v1932_v44, %v1241_v2  ;;  %v1243_v6 = vpop.f32.mrb[38].mxu0  ;;  %v1622_v44 = vld [vmem:[#allocation3 + $0x48] sm:$0xff]  }
0x172c   :  { %v1244_v7 = vpop.f32.mrb[39].mxu0 }
0x172d   :  { %1696 = vtanh.f32 %v1246_v4 }
0x1737   :  { %v1697_v8 = vpop.eup %1696 }
0x1738   :  { %v1248_v9 = vmul.f32 %v1697_v8, %v1842_v13  ;;  %v1620_v13 = vld [vmem:[#allocation3 + $0x40] sm:$0xff]  }
0x1739   :  { %1523 = vmatprep.subr.bf16.mxu1 %v1620_v13 }
0x173a   :  { %v1249_v10 = vadd.f32 %v1248_v9, %v1844_v15  ;;  %v1621_v15 = vld [vmem:[#allocation3] sm:$0xff]  }
0x173b   :  { %1524 = vmatpush3.bf16.msra.mxu1 %v1621_v15 }
0x173c   :  { %1252 = vrot.lane.b32.xlu1 %v1249_v10, %s1749_s11  ;;  %1525 = vmatprep.subr.bf16.mxu1 %v1622_v44 }
0x1740   :  { %903 = vrot.lane.b32.xlu1 %v2095_v35, %s1754_s0  ;;  %v1623_v35 = vld [vmem:[#allocation3 + $0x8] sm:$0xff]  }
0x1741   :  { %1526 = vmatpush3.bf16.msra.mxu1 %v1623_v35 }
0x1742   :  { %1527 = vmatprep.subr.bf16.mxu1 %v1624_v17 }
0x1745   :  { %1528 = vmatpush3.bf16.msra.mxu1 %v1625_v18 }
0x1746   :  { %1529 = vmatprep.subr.bf16.mxu1 %v1626_v20 }
0x1749   :  { %1530 = vmatpush3.bf16.msra.mxu1 %v1627_v21 }
0x17ae   :  { %v1253_v11 = vpop.permute.xlu1 %1252 }
0x17af   :  { %v1255_v14 = vmul.f32 %v1253_v11, %v1249_v10 }
0x17b1   :  { %1257 = vrot.lane.b32.xlu0 %v1255_v14, %s1754_s0 }
0x17b2   :  { %v904_v16 = vpop.permute.xlu1 %903 }
0x17b3   :  { %906 = vst.msk [vmem:[#allocation2 + $0x8] sm:$0xff] %vm149_vm5, %v904_v16 }
0x17b4   :  { %1051 = vst.msk [vmem:[#allocation2 + $0x8] sm:$0xff] %vm474_vm7, %v2132_v19  ;;  %v1628_v19 = vld [vmem:[#allocation3 + $0x60] sm:$0xff]  }
0x17b5   :  { %326 = vrot.lane.b32.xlu0 %v1946_v12, %s1754_s0  ;;  %1531 = vmatprep.subr.bf16.mxu1 %v1628_v19  ;;  %v1250_v12 = vmul.f32 %v1249_v10, %v1182_v50 }
0x17b6   :  { %1532 = vmatpush3.bf16.msra.mxu1 %v1629_v22 }
0x17b7   :  { %1533 = vmatprep.subr.bf16.mxu1 %v1630_v3 }
0x17b9   :  { %1190 = vrot.lane.b32.xlu0 %v1188_v57, %s1757_s4 }
0x17ba   :  { %1534 = vmatpush3.bf16.msra.mxu1 %v1631_v34 }
0x17bb   :  { %1535 = vmatprep.subr.bf16.mxu1 %v1632_v39 }
0x17be   :  { %1536 = vmatpush3.bf16.msra.mxu1 %v1633_v24 }
0x17bf   :  { %1537 = vmatprep.subr.bf16.mxu1 %v1634_v36 }
0x17c2   :  { %1538 = vmatpush3.bf16.msra.mxu1 %v1635_v33 }
0x1823   :  { %v1258_v30 = vpop.permute.xlu0 %1257 }
0x1824   :  { %v1260_v31 = vadd.f32 %v1258_v30, %v1250_v12 }
0x1826   :  { %1698 = vtanh.f32 %v1260_v31 }
0x1827   :  { %v327_v37 = vpop.permute.xlu0 %326 }
0x1828   :  { %329 = vst.msk [vmem:[#allocation2] sm:$0xff] %vm149_vm5, %v327_v37 }
0x1829   :  { %475 = vst.msk [vmem:[#allocation2] sm:$0xff] %vm474_vm7, %v1982_v63 }
0x182b   :  { %v1191_v25 = vpop.permute.xlu0 %1190 }
0x182c   :  { %1193 = vst.msk [vmem:[#allocation2 + $0x8] sm:$0xff] %vm617_vm8, %v1191_v25 }
0x1830   :  { %v1699_v38 = vpop.eup %1698 }
0x1831   :  { %1263 = vrot.lane.b32.xlu1 %v1699_v38, %s1749_s11 }
0x1835   :  { %614 = vrot.lane.b32.xlu1 %v2017_v54, %s1757_s4  ;;  %v1490_v54 = vld [vmem:[%s2205_s6] ss:$0 sm:$0xff] }
0x18a3   :  { %v1264_v63 = vpop.permute.xlu1 %1263 }
0x18a4   :  { %v1266_v26 = vmul.f32 %v1264_v63, %v1249_v10 }
0x18a6   :  { %1267 = vst.msk [vmem:[#allocation2 + $0x8] sm:$0xff] %vm759_vm9, %v1266_v26 }
0x18a7   :  { %v615_v40 = vpop.permute.xlu1 %614 }
0x18a8   :  { %618 = vst.msk [vmem:[#allocation2] sm:$0xff] %vm617_vm8, %v615_v40 }
0x18a9   :  { %760 = vst.msk [vmem:[#allocation2] sm:$0xff] %vm759_vm9, %v2059_v42 }
0x18ad   :  { %v1269_v27 = vld [vmem:[#allocation2 + $0x8] sm:$0xff] }
0x18ae   :  { %v1271_v28 = vpack.c.bf16 %v1269_v27, %v1269_v27 }
0x18b0   :  { %1439 = vmatprep.mubr.bf16.mxu1 %v1271_v28  ;;  %v1268_v29 = vld [vmem:[#allocation2] sm:$0xff] }
0x18b1   :  { %v1270_v32 = vpack.c.bf16 %v1268_v29, %v1268_v29 }
0x18b3   :  { %1440 = vmatmul.mubr.bf16.vlgmr.msra.gmra.mrb[24].mxu1 %v1270_v32 }
0x1986   :  { %v1539_v5 = vpop.f32.mrb[24].mxu1 }
0x1987   :  { %v1540_v41 = vpop.f32.mrb[25].mxu1 }
0x1988   :  { %v1541_v43 = vadd.f32 %v1540_v41, %v1539_v5  ;;  %v1542_v1 = vpop.f32.mrb[26].mxu1 }
0x1989   :  { %v1543_v45 = vpop.f32.mrb[27].mxu1 }
0x198a   :  { %v1442_v46 = vadd.f32 %v1541_v43, %v1490_v54 }
0x198c   :  { %1447 = vst [vmem:[#allocation6] sm:$0xff] %v1442_v46 }
0x198d   :  { %1733 = shalt.err (!%p1730_p12)
}
0x198e   :  { %s1734_s6 = scalar_lea.hbm %s2206_s7, 128 }
0x198f   :  { %p1735_p13 = scmp.ne.s32.totalorder %s2206_s7, %s1734_s6  ;;  %p1738_p0 = scmp.lt.u32.totalorder %s1734_s6, %s2206_s7 }
0x1991   :  { %p1740_p1 = pnand %p1738_p0, %p1735_p13 }
0x1993   :  { %1743 = shalt.err (!%p1740_p1)
}
0x1994   :  { %1457 = dma.vmem_to_hbm [thread:$0]  %s1455_s1, 128, %s2206_s7, [#allocation5]  }
0x1995   :  { %1746 = dma.done.wait [#allocation5], 128  }
0x1996   :  { %1747 = vsyncadd [#allocation5], 4294967168 }
0x1997   :  { %1461 = vsyncpa [#allocation4], 1 }
0x1998   :  { %1462 = vsyncpa [#allocation5], 1 }

</bundles_post_ra>
